<compile_context>
chip_gen: v7x
topology: tpu7x:2x2x1
jax: 0.10.0
libtpu: 0.0.40
codegen_flags: <defaults>
</compile_context>

<pallas_src>
import functools

import jax
import jax.numpy as jnp
from jax.experimental import pallas as pl
from jax.experimental.pallas import tpu as pltpu


def _round_up(x, m):
    return ((x + m - 1) // m) * m


# ---------------------------------------------------------------------------
# Fused projection + recurrence kernel.
# Grid: (batch_tiles [parallel], time_chunks [arbitrary]).
# Per grid step, for t in [0, t_chunk):
#   pre_t = x_t @ W_comb + b_comb          (off the serial chain)
#   h     = tanh(pre_t + h @ Wh)           (serial chain)
#   out_t = h
# ---------------------------------------------------------------------------
def _rnn_fused_kernel(x_ref, w_ref, b_ref, wh_ref, o_ref, h_scr, *, t_chunk):
    c = pl.program_id(1)  # time-chunk index (innermost, sequential)

    @pl.when(c == 0)
    def _():
        h_scr[...] = jnp.zeros_like(h_scr)

    # Hoist all weight loads out of the unrolled time loop.
    w = w_ref[...]          # (dim, hidden_p)      f32
    b = b_ref[...]          # (1, hidden_p)        f32
    wh = wh_ref[...]        # (hidden_p, hidden_p) f32 or bf16
    h = h_scr[...]          # (tile_b, hidden_p)   f32

    # Statically unrolled so the scheduler sees the whole chunk and can hide
    # the independent pre_t matmuls under the serial matmul->add->tanh chain.
    for t in range(t_chunk):
        pre_t = jnp.dot(x_ref[t], w, preferred_element_type=jnp.float32) + b
        h = jnp.tanh(
            pre_t
            + jnp.dot(h.astype(wh.dtype), wh, preferred_element_type=jnp.float32)
        )
        o_ref[t] = h.astype(o_ref.dtype)

    h_scr[...] = h


def rnntext_forward(x, params, *, t_chunk=16, tile_b=None,
                    wh_dtype=jnp.float32):
    """x: (seq, batch, dim) f32 -> (seq, batch, hidden) f32."""
    seq, batch, dim = x.shape
    wfc_t, bfc, wx_t, bx, wh_t, bh = params
    hidden = wh_t.shape[0]

    # ---- fold fc + RNN input-projection into one linear map (done once,
    #      outside the sequential path); fold ALL biases into b_comb ----
    w_comb = wfc_t @ wx_t                    # (dim, hidden)
    b_comb = bfc @ wx_t + bx + bh            # (hidden,)

    # ---- pad to TPU-friendly shapes ----
    hidden_p = _round_up(hidden, 128)        # lane-dense stores / aligned layout
    batch_p = _round_up(batch, 8)            # f32 sublane count
    seq_p = _round_up(seq, t_chunk)

    # Batch tiling: split into two tiles when large enough so v7x's second
    # TensorCore gets work on the "parallel" axis (1 tile otherwise).
    if tile_b is None:
        if batch_p >= 16 and (batch_p // 2) % 8 == 0:
            tile_b = batch_p // 2
        else:
            tile_b = batch_p
    assert batch_p % tile_b == 0 and tile_b % 8 == 0

    w_comb_p = jnp.zeros((dim, hidden_p), jnp.float32).at[:, :hidden].set(w_comb)
    b_comb_p = jnp.zeros((1, hidden_p), jnp.float32).at[0, :hidden].set(b_comb)
    # Zero-padded Wh columns keep padded hidden lanes at exactly 0.
    wh_p = (jnp.zeros((hidden_p, hidden_p), jnp.float32)
            .at[:hidden, :hidden].set(wh_t).astype(wh_dtype))

    # Single padding op for x (no intermediate zeros().at[].set() copies).
    x_p = jnp.pad(x.astype(jnp.float32),
                  ((0, seq_p - seq), (0, batch_p - batch), (0, 0)))

    kernel = functools.partial(_rnn_fused_kernel, t_chunk=t_chunk)

    # NOTE: for very large hidden on v7x (64 MiB VMEM) the constant-index
    # weight BlockSpecs could additionally use pipeline_mode=pl.Buffered(1)
    # and/or an N-tiled hidden axis; unnecessary at these sizes.
    out_p = pl.pallas_call(
        kernel,
        out_shape=jax.ShapeDtypeStruct((seq_p, batch_p, hidden_p), jnp.float32),
        grid_spec=pltpu.PrefetchScalarGridSpec(
            num_scalar_prefetch=0,
            grid=(batch_p // tile_b, seq_p // t_chunk),
            in_specs=[
                pl.BlockSpec((t_chunk, tile_b, dim),
                             lambda bt, c: (c, bt, 0)),               # x chunk
                pl.BlockSpec((dim, hidden_p), lambda bt, c: (0, 0)),  # W_comb
                pl.BlockSpec((1, hidden_p), lambda bt, c: (0, 0)),    # b_comb
                pl.BlockSpec((hidden_p, hidden_p),
                             lambda bt, c: (0, 0)),                   # Wh
            ],
            out_specs=pl.BlockSpec((t_chunk, tile_b, hidden_p),
                                   lambda bt, c: (c, bt, 0)),
            scratch_shapes=[pltpu.VMEM((tile_b, hidden_p), jnp.float32)],
        ),
        compiler_params=pltpu.CompilerParams(
            # batch tiles are independent (megacore-shardable); the time axis
            # carries the h scratch and must stay sequential.
            dimension_semantics=("parallel", "arbitrary"),
            vmem_limit_bytes=64 * 1024 * 1024,
        ),
    )(x_p, w_comb_p, b_comb_p, wh_p)

    return out_p[:seq, :batch, :hidden]


def _reference_forward(x, params):
    """Pure-JAX reference of the module's forward pass (un-fused order)."""
    wfc_t, bfc, wx_t, bx, wh_t, bh = params
    enc = x @ wfc_t + bfc                         # (seq, batch, dim_encoded)

    def step(h, e_t):
        h_new = jnp.tanh(e_t @ wx_t + bx + h @ wh_t + bh)
        return h_new, h_new

    h0 = jnp.zeros((x.shape[1], wx_t.shape[1]), jnp.float32)
    _, hs = jax.lax.scan(step, h0, enc)
    return hs                                     # (seq, batch, hidden)


if __name__ == "__main__":
    # small shapes consistent with the module
    seq, batch = 8, 2
    dim, dim_encoded, hidden_size, output_size = 16, 32, 20, 10

    key = jax.random.PRNGKey(0)
    k = jax.random.split(key, 8)

    # PyTorch nn.Linear weight is (out, in); we store the transposes so the
    # kernel does (rows, in) @ (in, out).
    wfc_t = jax.random.normal(k[0], (dim, dim_encoded), jnp.float32) * 0.1
    bfc   = jax.random.normal(k[1], (dim_encoded,), jnp.float32) * 0.1
    wx_t  = jax.random.normal(k[2], (dim_encoded, hidden_size), jnp.float32) * 0.1
    bx    = jax.random.normal(k[3], (hidden_size,), jnp.float32) * 0.1
    wh_t  = jax.random.normal(k[4], (hidden_size, hidden_size), jnp.float32) * 0.1
    bh    = jax.random.normal(k[5], (hidden_size,), jnp.float32) * 0.1
    # TODO(synk): RNN.decode (Linear hidden->output_size) is not exercised by forward().
    params = (wfc_t, bfc, wx_t, bx, wh_t, bh)

    x = jax.random.normal(k[6], (seq, batch, dim), jnp.float32)

    out = jax.block_until_ready(rnntext_forward(x, params))
    ref = _reference_forward(x, params)

    assert out.shape == (seq, batch, hidden_size)
    # Slightly looser tolerance: the folded W_comb = Wfc^T @ Wx^T changes the
    # f32 association order vs. the reference (~1e-6 level differences).
    assert jnp.allclose(out, ref, atol=1e-4, rtol=1e-4), "mismatch vs reference"

    # Exercise the bf16-Wh MXU path (v6e/v7x latency optimization); numerics
    # compound through the tanh recurrence, so only a loose sanity check.
    out_bf16 = jax.block_until_ready(
        rnntext_forward(x, params, wh_dtype=jnp.bfloat16))
    assert out_bf16.shape == (seq, batch, hidden_size)
    assert jnp.allclose(out_bf16, ref, atol=5e-2, rtol=5e-2), "bf16 path diverged"

    print("KERNEL_OK")
</pallas_src>

<mosaic_0001>
module attributes {stable_mosaic.version = 11 : i64} {
  func.func @_rnn_fused_kernel(%arg0: i32, %arg1: i32, %arg2: memref<16x8x16xf32, #tpu.memory_space<vmem>>, %arg3: memref<16x128xf32, #tpu.memory_space<vmem>>, %arg4: memref<1x128xf32, #tpu.memory_space<vmem>>, %arg5: memref<128x128xf32, #tpu.memory_space<vmem>>, %arg6: memref<16x8x128xf32, #tpu.memory_space<vmem>>, %arg7: memref<8x128xf32, #tpu.memory_space<vmem>>) attributes {dimension_semantics = [#tpu.dimension_semantics<parallel>, #tpu.dimension_semantics<arbitrary>], iteration_bounds = array<i64: 1, 1>, scalar_prefetch = 0 : i64, scratch_operands = 1 : i64, tpu.core_type = #tpu.core_type<tc>, window_params = [{transform_indices = @transform_0, window_bounds = array<i64: 16, 8, 16>}, {pipeline_mode = #tpu.pipeline_mode<synchronous>, transform_indices = @transform_1, window_bounds = array<i64: 16, 128>}, {pipeline_mode = #tpu.pipeline_mode<synchronous>, transform_indices = @transform_2, window_bounds = array<i64: 1, 128>}, {pipeline_mode = #tpu.pipeline_mode<synchronous>, transform_indices = @transform_3, window_bounds = array<i64: 128, 128>}, {transform_indices = @transform_4, window_bounds = array<i64: 16, 8, 128>}]} {
    %c0_i32 = arith.constant 0 : i32
    %0 = arith.cmpi eq, %arg1, %c0_i32 : i32
    %1 = arith.extui %0 : i1 to i32
    %c0_i32_0 = arith.constant 0 : i32
    %2 = arith.cmpi ne, %1, %c0_i32_0 : i32
    scf.if %2 {
      %cst_122 = arith.constant 0.000000e+00 : f32
      %184 = vector.broadcast %cst_122 : f32 to vector<8x128xf32>
      %c0_123 = arith.constant 0 : index
      %c0_124 = arith.constant 0 : index
      %185 = vector.load %arg7[%c0_123, %c0_124] : memref<8x128xf32, #tpu.memory_space<vmem>>, vector<8x128xf32>
      tpu.vector_store %arg7[%c0_123, %c0_124], %184 {strides = array<i32>} : memref<8x128xf32, #tpu.memory_space<vmem>>, vector<8x128xf32>,
    } else {
    }
    %c0 = arith.constant 0 : index
    %c0_1 = arith.constant 0 : index
    %3 = vector.load %arg3[%c0, %c0_1] : memref<16x128xf32, #tpu.memory_space<vmem>>, vector<16x128xf32>
    %c0_2 = arith.constant 0 : index
    %c0_3 = arith.constant 0 : index
    %4 = vector.load %arg4[%c0_2, %c0_3] : memref<1x128xf32, #tpu.memory_space<vmem>>, vector<1x128xf32>
    %c0_4 = arith.constant 0 : index
    %c0_5 = arith.constant 0 : index
    %5 = vector.load %arg5[%c0_4, %c0_5] : memref<128x128xf32, #tpu.memory_space<vmem>>, vector<128x128xf32>
    %c0_6 = arith.constant 0 : index
    %c0_7 = arith.constant 0 : index
    %6 = vector.load %arg7[%c0_6, %c0_7] : memref<8x128xf32, #tpu.memory_space<vmem>>, vector<8x128xf32>
    %c0_8 = arith.constant 0 : index
    %c0_9 = arith.constant 0 : index
    %c0_10 = arith.constant 0 : index
    %7 = vector.load %arg2[%c0_8, %c0_9, %c0_10] : memref<16x8x16xf32, #tpu.memory_space<vmem>>, vector<1x8x16xf32>
    %8 = vector.shape_cast %7 : vector<1x8x16xf32> to vector<8x16xf32>
    %cst = arith.constant dense<0.000000e+00> : vector<8x128xf32>
    %9 = tpu.matmul %8, %3, %cst {dimension_numbers = #tpu.dot_dimension_numbers<[1], [0], [0], [1], [0, 0, 1, 1], [], []>} : vector<8x16xf32>, vector<16x128xf32>, vector<8x128xf32> -> vector<8x128xf32>
    %10 = vector.broadcast %4 : vector<1x128xf32> to vector<8x128xf32>
    %11 = arith.addf %9, %10 : vector<8x128xf32>
    %cst_11 = arith.constant dense<0.000000e+00> : vector<8x128xf32>
    %12 = tpu.matmul %6, %5, %cst_11 {dimension_numbers = #tpu.dot_dimension_numbers<[1], [0], [0], [1], [0, 0, 1, 1], [], []>} : vector<8x128xf32>, vector<128x128xf32>, vector<8x128xf32> -> vector<8x128xf32>
    %13 = arith.addf %11, %12 : vector<8x128xf32>
    %14 = math.tanh %13 : vector<8x128xf32>
    %c0_12 = arith.constant 0 : index
    %c0_13 = arith.constant 0 : index
    %c0_14 = arith.constant 0 : index
    %15 = vector.load %arg6[%c0_12, %c0_13, %c0_14] : memref<16x8x128xf32, #tpu.memory_space<vmem>>, vector<1x8x128xf32>
    %16 = vector.shape_cast %15 : vector<1x8x128xf32> to vector<8x128xf32>
    %17 = vector.shape_cast %14 : vector<8x128xf32> to vector<1x8x128xf32>
    tpu.vector_store %arg6[%c0_12, %c0_13, %c0_14], %17 {strides = array<i32>} : memref<16x8x128xf32, #tpu.memory_space<vmem>>, vector<1x8x128xf32>,
    %c1 = arith.constant 1 : index
    %c0_15 = arith.constant 0 : index
    %c0_16 = arith.constant 0 : index
    %18 = vector.load %arg2[%c1, %c0_15, %c0_16] : memref<16x8x16xf32, #tpu.memory_space<vmem>>, vector<1x8x16xf32>
    %19 = vector.shape_cast %18 : vector<1x8x16xf32> to vector<8x16xf32>
    %cst_17 = arith.constant dense<0.000000e+00> : vector<8x128xf32>
    %20 = tpu.matmul %19, %3, %cst_17 {dimension_numbers = #tpu.dot_dimension_numbers<[1], [0], [0], [1], [0, 0, 1, 1], [], []>} : vector<8x16xf32>, vector<16x128xf32>, vector<8x128xf32> -> vector<8x128xf32>
    %21 = vector.broadcast %4 : vector<1x128xf32> to vector<8x128xf32>
    %22 = arith.addf %20, %21 : vector<8x128xf32>
    %cst_18 = arith.constant dense<0.000000e+00> : vector<8x128xf32>
    %23 = tpu.matmul %14, %5, %cst_18 {dimension_numbers = #tpu.dot_dimension_numbers<[1], [0], [0], [1], [0, 0, 1, 1], [], []>} : vector<8x128xf32>, vector<128x128xf32>, vector<8x128xf32> -> vector<8x128xf32>
    %24 = arith.addf %22, %23 : vector<8x128xf32>
    %25 = math.tanh %24 : vector<8x128xf32>
    %c1_19 = arith.constant 1 : index
    %c0_20 = arith.constant 0 : index
    %c0_21 = arith.constant 0 : index
    %26 = vector.load %arg6[%c1_19, %c0_20, %c0_21] : memref<16x8x128xf32, #tpu.memory_space<vmem>>, vector<1x8x128xf32>
    %27 = vector.shape_cast %26 : vector<1x8x128xf32> to vector<8x128xf32>
    %28 = vector.shape_cast %25 : vector<8x128xf32> to vector<1x8x128xf32>
    tpu.vector_store %arg6[%c1_19, %c0_20, %c0_21], %28 {strides = array<i32>} : memref<16x8x128xf32, #tpu.memory_space<vmem>>, vector<1x8x128xf32>,
    %c2 = arith.constant 2 : index
    %c0_22 = arith.constant 0 : index
    %c0_23 = arith.constant 0 : index
    %29 = vector.load %arg2[%c2, %c0_22, %c0_23] : memref<16x8x16xf32, #tpu.memory_space<vmem>>, vector<1x8x16xf32>
    %30 = vector.shape_cast %29 : vector<1x8x16xf32> to vector<8x16xf32>
    %cst_24 = arith.constant dense<0.000000e+00> : vector<8x128xf32>
    %31 = tpu.matmul %30, %3, %cst_24 {dimension_numbers = #tpu.dot_dimension_numbers<[1], [0], [0], [1], [0, 0, 1, 1], [], []>} : vector<8x16xf32>, vector<16x128xf32>, vector<8x128xf32> -> vector<8x128xf32>
    %32 = vector.broadcast %4 : vector<1x128xf32> to vector<8x128xf32>
    %33 = arith.addf %31, %32 : vector<8x128xf32>
    %cst_25 = arith.constant dense<0.000000e+00> : vector<8x128xf32>
    %34 = tpu.matmul %25, %5, %cst_25 {dimension_numbers = #tpu.dot_dimension_numbers<[1], [0], [0], [1], [0, 0, 1, 1], [], []>} : vector<8x128xf32>, vector<128x128xf32>, vector<8x128xf32> -> vector<8x128xf32>
    %35 = arith.addf %33, %34 : vector<8x128xf32>
    %36 = math.tanh %35 : vector<8x128xf32>
    %c2_26 = arith.constant 2 : index
    %c0_27 = arith.constant 0 : index
    %c0_28 = arith.constant 0 : index
    %37 = vector.load %arg6[%c2_26, %c0_27, %c0_28] : memref<16x8x128xf32, #tpu.memory_space<vmem>>, vector<1x8x128xf32>
    %38 = vector.shape_cast %37 : vector<1x8x128xf32> to vector<8x128xf32>
    %39 = vector.shape_cast %36 : vector<8x128xf32> to vector<1x8x128xf32>
    tpu.vector_store %arg6[%c2_26, %c0_27, %c0_28], %39 {strides = array<i32>} : memref<16x8x128xf32, #tpu.memory_space<vmem>>, vector<1x8x128xf32>,
    %c3 = arith.constant 3 : index
    %c0_29 = arith.constant 0 : index
    %c0_30 = arith.constant 0 : index
    %40 = vector.load %arg2[%c3, %c0_29, %c0_30] : memref<16x8x16xf32, #tpu.memory_space<vmem>>, vector<1x8x16xf32>
    %41 = vector.shape_cast %40 : vector<1x8x16xf32> to vector<8x16xf32>
    %cst_31 = arith.constant dense<0.000000e+00> : vector<8x128xf32>
    %42 = tpu.matmul %41, %3, %cst_31 {dimension_numbers = #tpu.dot_dimension_numbers<[1], [0], [0], [1], [0, 0, 1, 1], [], []>} : vector<8x16xf32>, vector<16x128xf32>, vector<8x128xf32> -> vector<8x128xf32>
    %43 = vector.broadcast %4 : vector<1x128xf32> to vector<8x128xf32>
    %44 = arith.addf %42, %43 : vector<8x128xf32>
    %cst_32 = arith.constant dense<0.000000e+00> : vector<8x128xf32>
    %45 = tpu.matmul %36, %5, %cst_32 {dimension_numbers = #tpu.dot_dimension_numbers<[1], [0], [0], [1], [0, 0, 1, 1], [], []>} : vector<8x128xf32>, vector<128x128xf32>, vector<8x128xf32> -> vector<8x128xf32>
    %46 = arith.addf %44, %45 : vector<8x128xf32>
    %47 = math.tanh %46 : vector<8x128xf32>
    %c3_33 = arith.constant 3 : index
    %c0_34 = arith.constant 0 : index
    %c0_35 = arith.constant 0 : index
    %48 = vector.load %arg6[%c3_33, %c0_34, %c0_35] : memref<16x8x128xf32, #tpu.memory_space<vmem>>, vector<1x8x128xf32>
    %49 = vector.shape_cast %48 : vector<1x8x128xf32> to vector<8x128xf32>
    %50 = vector.shape_cast %47 : vector<8x128xf32> to vector<1x8x128xf32>
    tpu.vector_store %arg6[%c3_33, %c0_34, %c0_35], %50 {strides = array<i32>} : memref<16x8x128xf32, #tpu.memory_space<vmem>>, vector<1x8x128xf32>,
    %c4 = arith.constant 4 : index
    %c0_36 = arith.constant 0 : index
    %c0_37 = arith.constant 0 : index
    %51 = vector.load %arg2[%c4, %c0_36, %c0_37] : memref<16x8x16xf32, #tpu.memory_space<vmem>>, vector<1x8x16xf32>
    %52 = vector.shape_cast %51 : vector<1x8x16xf32> to vector<8x16xf32>
    %cst_38 = arith.constant dense<0.000000e+00> : vector<8x128xf32>
    %53 = tpu.matmul %52, %3, %cst_38 {dimension_numbers = #tpu.dot_dimension_numbers<[1], [0], [0], [1], [0, 0, 1, 1], [], []>} : vector<8x16xf32>, vector<16x128xf32>, vector<8x128xf32> -> vector<8x128xf32>
    %54 = vector.broadcast %4 : vector<1x128xf32> to vector<8x128xf32>
    %55 = arith.addf %53, %54 : vector<8x128xf32>
    %cst_39 = arith.constant dense<0.000000e+00> : vector<8x128xf32>
    %56 = tpu.matmul %47, %5, %cst_39 {dimension_numbers = #tpu.dot_dimension_numbers<[1], [0], [0], [1], [0, 0, 1, 1], [], []>} : vector<8x128xf32>, vector<128x128xf32>, vector<8x128xf32> -> vector<8x128xf32>
    %57 = arith.addf %55, %56 : vector<8x128xf32>
    %58 = math.tanh %57 : vector<8x128xf32>
    %c4_40 = arith.constant 4 : index
    %c0_41 = arith.constant 0 : index
    %c0_42 = arith.constant 0 : index
    %59 = vector.load %arg6[%c4_40, %c0_41, %c0_42] : memref<16x8x128xf32, #tpu.memory_space<vmem>>, vector<1x8x128xf32>
    %60 = vector.shape_cast %59 : vector<1x8x128xf32> to vector<8x128xf32>
    %61 = vector.shape_cast %58 : vector<8x128xf32> to vector<1x8x128xf32>
    tpu.vector_store %arg6[%c4_40, %c0_41, %c0_42], %61 {strides = array<i32>} : memref<16x8x128xf32, #tpu.memory_space<vmem>>, vector<1x8x128xf32>,
    %c5 = arith.constant 5 : index
    %c0_43 = arith.constant 0 : index
    %c0_44 = arith.constant 0 : index
    %62 = vector.load %arg2[%c5, %c0_43, %c0_44] : memref<16x8x16xf32, #tpu.memory_space<vmem>>, vector<1x8x16xf32>
    %63 = vector.shape_cast %62 : vector<1x8x16xf32> to vector<8x16xf32>
    %cst_45 = arith.constant dense<0.000000e+00> : vector<8x128xf32>
    %64 = tpu.matmul %63, %3, %cst_45 {dimension_numbers = #tpu.dot_dimension_numbers<[1], [0], [0], [1], [0, 0, 1, 1], [], []>} : vector<8x16xf32>, vector<16x128xf32>, vector<8x128xf32> -> vector<8x128xf32>
    %65 = vector.broadcast %4 : vector<1x128xf32> to vector<8x128xf32>
    %66 = arith.addf %64, %65 : vector<8x128xf32>
    %cst_46 = arith.constant dense<0.000000e+00> : vector<8x128xf32>
    %67 = tpu.matmul %58, %5, %cst_46 {dimension_numbers = #tpu.dot_dimension_numbers<[1], [0], [0], [1], [0, 0, 1, 1], [], []>} : vector<8x128xf32>, vector<128x128xf32>, vector<8x128xf32> -> vector<8x128xf32>
    %68 = arith.addf %66, %67 : vector<8x128xf32>
    %69 = math.tanh %68 : vector<8x128xf32>
    %c5_47 = arith.constant 5 : index
    %c0_48 = arith.constant 0 : index
    %c0_49 = arith.constant 0 : index
    %70 = vector.load %arg6[%c5_47, %c0_48, %c0_49] : memref<16x8x128xf32, #tpu.memory_space<vmem>>, vector<1x8x128xf32>
    %71 = vector.shape_cast %70 : vector<1x8x128xf32> to vector<8x128xf32>
    %72 = vector.shape_cast %69 : vector<8x128xf32> to vector<1x8x128xf32>
    tpu.vector_store %arg6[%c5_47, %c0_48, %c0_49], %72 {strides = array<i32>} : memref<16x8x128xf32, #tpu.memory_space<vmem>>, vector<1x8x128xf32>,
    %c6 = arith.constant 6 : index
    %c0_50 = arith.constant 0 : index
    %c0_51 = arith.constant 0 : index
    %73 = vector.load %arg2[%c6, %c0_50, %c0_51] : memref<16x8x16xf32, #tpu.memory_space<vmem>>, vector<1x8x16xf32>
    %74 = vector.shape_cast %73 : vector<1x8x16xf32> to vector<8x16xf32>
    %cst_52 = arith.constant dense<0.000000e+00> : vector<8x128xf32>
    %75 = tpu.matmul %74, %3, %cst_52 {dimension_numbers = #tpu.dot_dimension_numbers<[1], [0], [0], [1], [0, 0, 1, 1], [], []>} : vector<8x16xf32>, vector<16x128xf32>, vector<8x128xf32> -> vector<8x128xf32>
    %76 = vector.broadcast %4 : vector<1x128xf32> to vector<8x128xf32>
    %77 = arith.addf %75, %76 : vector<8x128xf32>
    %cst_53 = arith.constant dense<0.000000e+00> : vector<8x128xf32>
    %78 = tpu.matmul %69, %5, %cst_53 {dimension_numbers = #tpu.dot_dimension_numbers<[1], [0], [0], [1], [0, 0, 1, 1], [], []>} : vector<8x128xf32>, vector<128x128xf32>, vector<8x128xf32> -> vector<8x128xf32>
    %79 = arith.addf %77, %78 : vector<8x128xf32>
    %80 = math.tanh %79 : vector<8x128xf32>
    %c6_54 = arith.constant 6 : index
    %c0_55 = arith.constant 0 : index
    %c0_56 = arith.constant 0 : index
    %81 = vector.load %arg6[%c6_54, %c0_55, %c0_56] : memref<16x8x128xf32, #tpu.memory_space<vmem>>, vector<1x8x128xf32>
    %82 = vector.shape_cast %81 : vector<1x8x128xf32> to vector<8x128xf32>
    %83 = vector.shape_cast %80 : vector<8x128xf32> to vector<1x8x128xf32>
    tpu.vector_store %arg6[%c6_54, %c0_55, %c0_56], %83 {strides = array<i32>} : memref<16x8x128xf32, #tpu.memory_space<vmem>>, vector<1x8x128xf32>,
    %c7 = arith.constant 7 : index
    %c0_57 = arith.constant 0 : index
    %c0_58 = arith.constant 0 : index
    %84 = vector.load %arg2[%c7, %c0_57, %c0_58] : memref<16x8x16xf32, #tpu.memory_space<vmem>>, vector<1x8x16xf32>
    %85 = vector.shape_cast %84 : vector<1x8x16xf32> to vector<8x16xf32>
    %cst_59 = arith.constant dense<0.000000e+00> : vector<8x128xf32>
    %86 = tpu.matmul %85, %3, %cst_59 {dimension_numbers = #tpu.dot_dimension_numbers<[1], [0], [0], [1], [0, 0, 1, 1], [], []>} : vector<8x16xf32>, vector<16x128xf32>, vector<8x128xf32> -> vector<8x128xf32>
    %87 = vector.broadcast %4 : vector<1x128xf32> to vector<8x128xf32>
    %88 = arith.addf %86, %87 : vector<8x128xf32>
    %cst_60 = arith.constant dense<0.000000e+00> : vector<8x128xf32>
    %89 = tpu.matmul %80, %5, %cst_60 {dimension_numbers = #tpu.dot_dimension_numbers<[1], [0], [0], [1], [0, 0, 1, 1], [], []>} : vector<8x128xf32>, vector<128x128xf32>, vector<8x128xf32> -> vector<8x128xf32>
    %90 = arith.addf %88, %89 : vector<8x128xf32>
    %91 = math.tanh %90 : vector<8x128xf32>
    %c7_61 = arith.constant 7 : index
    %c0_62 = arith.constant 0 : index
    %c0_63 = arith.constant 0 : index
    %92 = vector.load %arg6[%c7_61, %c0_62, %c0_63] : memref<16x8x128xf32, #tpu.memory_space<vmem>>, vector<1x8x128xf32>
    %93 = vector.shape_cast %92 : vector<1x8x128xf32> to vector<8x128xf32>
    %94 = vector.shape_cast %91 : vector<8x128xf32> to vector<1x8x128xf32>
    tpu.vector_store %arg6[%c7_61, %c0_62, %c0_63], %94 {strides = array<i32>} : memref<16x8x128xf32, #tpu.memory_space<vmem>>, vector<1x8x128xf32>,
    %c8 = arith.constant 8 : index
    %c0_64 = arith.constant 0 : index
    %c0_65 = arith.constant 0 : index
    %95 = vector.load %arg2[%c8, %c0_64, %c0_65] : memref<16x8x16xf32, #tpu.memory_space<vmem>>, vector<1x8x16xf32>
    %96 = vector.shape_cast %95 : vector<1x8x16xf32> to vector<8x16xf32>
    %cst_66 = arith.constant dense<0.000000e+00> : vector<8x128xf32>
    %97 = tpu.matmul %96, %3, %cst_66 {dimension_numbers = #tpu.dot_dimension_numbers<[1], [0], [0], [1], [0, 0, 1, 1], [], []>} : vector<8x16xf32>, vector<16x128xf32>, vector<8x128xf32> -> vector<8x128xf32>
    %98 = vector.broadcast %4 : vector<1x128xf32> to vector<8x128xf32>
    %99 = arith.addf %97, %98 : vector<8x128xf32>
    %cst_67 = arith.constant dense<0.000000e+00> : vector<8x128xf32>
    %100 = tpu.matmul %91, %5, %cst_67 {dimension_numbers = #tpu.dot_dimension_numbers<[1], [0], [0], [1], [0, 0, 1, 1], [], []>} : vector<8x128xf32>, vector<128x128xf32>, vector<8x128xf32> -> vector<8x128xf32>
    %101 = arith.addf %99, %100 : vector<8x128xf32>
    %102 = math.tanh %101 : vector<8x128xf32>
    %c8_68 = arith.constant 8 : index
    %c0_69 = arith.constant 0 : index
    %c0_70 = arith.constant 0 : index
    %103 = vector.load %arg6[%c8_68, %c0_69, %c0_70] : memref<16x8x128xf32, #tpu.memory_space<vmem>>, vector<1x8x128xf32>
    %104 = vector.shape_cast %103 : vector<1x8x128xf32> to vector<8x128xf32>
    %105 = vector.shape_cast %102 : vector<8x128xf32> to vector<1x8x128xf32>
    tpu.vector_store %arg6[%c8_68, %c0_69, %c0_70], %105 {strides = array<i32>} : memref<16x8x128xf32, #tpu.memory_space<vmem>>, vector<1x8x128xf32>,
    %c9 = arith.constant 9 : index
    %c0_71 = arith.constant 0 : index
    %c0_72 = arith.constant 0 : index
    %106 = vector.load %arg2[%c9, %c0_71, %c0_72] : memref<16x8x16xf32, #tpu.memory_space<vmem>>, vector<1x8x16xf32>
    %107 = vector.shape_cast %106 : vector<1x8x16xf32> to vector<8x16xf32>
    %cst_73 = arith.constant dense<0.000000e+00> : vector<8x128xf32>
    %108 = tpu.matmul %107, %3, %cst_73 {dimension_numbers = #tpu.dot_dimension_numbers<[1], [0], [0], [1], [0, 0, 1, 1], [], []>} : vector<8x16xf32>, vector<16x128xf32>, vector<8x128xf32> -> vector<8x128xf32>
    %109 = vector.broadcast %4 : vector<1x128xf32> to vector<8x128xf32>
    %110 = arith.addf %108, %109 : vector<8x128xf32>
    %cst_74 = arith.constant dense<0.000000e+00> : vector<8x128xf32>
    %111 = tpu.matmul %102, %5, %cst_74 {dimension_numbers = #tpu.dot_dimension_numbers<[1], [0], [0], [1], [0, 0, 1, 1], [], []>} : vector<8x128xf32>, vector<128x128xf32>, vector<8x128xf32> -> vector<8x128xf32>
    %112 = arith.addf %110, %111 : vector<8x128xf32>
    %113 = math.tanh %112 : vector<8x128xf32>
    %c9_75 = arith.constant 9 : index
    %c0_76 = arith.constant 0 : index
    %c0_77 = arith.constant 0 : index
    %114 = vector.load %arg6[%c9_75, %c0_76, %c0_77] : memref<16x8x128xf32, #tpu.memory_space<vmem>>, vector<1x8x128xf32>
    %115 = vector.shape_cast %114 : vector<1x8x128xf32> to vector<8x128xf32>
    %116 = vector.shape_cast %113 : vector<8x128xf32> to vector<1x8x128xf32>
    tpu.vector_store %arg6[%c9_75, %c0_76, %c0_77], %116 {strides = array<i32>} : memref<16x8x128xf32, #tpu.memory_space<vmem>>, vector<1x8x128xf32>,
    %c10 = arith.constant 10 : index
    %c0_78 = arith.constant 0 : index
    %c0_79 = arith.constant 0 : index
    %117 = vector.load %arg2[%c10, %c0_78, %c0_79] : memref<16x8x16xf32, #tpu.memory_space<vmem>>, vector<1x8x16xf32>
    %118 = vector.shape_cast %117 : vector<1x8x16xf32> to vector<8x16xf32>
    %cst_80 = arith.constant dense<0.000000e+00> : vector<8x128xf32>
    %119 = tpu.matmul %118, %3, %cst_80 {dimension_numbers = #tpu.dot_dimension_numbers<[1], [0], [0], [1], [0, 0, 1, 1], [], []>} : vector<8x16xf32>, vector<16x128xf32>, vector<8x128xf32> -> vector<8x128xf32>
    %120 = vector.broadcast %4 : vector<1x128xf32> to vector<8x128xf32>
    %121 = arith.addf %119, %120 : vector<8x128xf32>
    %cst_81 = arith.constant dense<0.000000e+00> : vector<8x128xf32>
    %122 = tpu.matmul %113, %5, %cst_81 {dimension_numbers = #tpu.dot_dimension_numbers<[1], [0], [0], [1], [0, 0, 1, 1], [], []>} : vector<8x128xf32>, vector<128x128xf32>, vector<8x128xf32> -> vector<8x128xf32>
    %123 = arith.addf %121, %122 : vector<8x128xf32>
    %124 = math.tanh %123 : vector<8x128xf32>
    %c10_82 = arith.constant 10 : index
    %c0_83 = arith.constant 0 : index
    %c0_84 = arith.constant 0 : index
    %125 = vector.load %arg6[%c10_82, %c0_83, %c0_84] : memref<16x8x128xf32, #tpu.memory_space<vmem>>, vector<1x8x128xf32>
    %126 = vector.shape_cast %125 : vector<1x8x128xf32> to vector<8x128xf32>
    %127 = vector.shape_cast %124 : vector<8x128xf32> to vector<1x8x128xf32>
    tpu.vector_store %arg6[%c10_82, %c0_83, %c0_84], %127 {strides = array<i32>} : memref<16x8x128xf32, #tpu.memory_space<vmem>>, vector<1x8x128xf32>,
    %c11 = arith.constant 11 : index
    %c0_85 = arith.constant 0 : index
    %c0_86 = arith.constant 0 : index
    %128 = vector.load %arg2[%c11, %c0_85, %c0_86] : memref<16x8x16xf32, #tpu.memory_space<vmem>>, vector<1x8x16xf32>
    %129 = vector.shape_cast %128 : vector<1x8x16xf32> to vector<8x16xf32>
    %cst_87 = arith.constant dense<0.000000e+00> : vector<8x128xf32>
    %130 = tpu.matmul %129, %3, %cst_87 {dimension_numbers = #tpu.dot_dimension_numbers<[1], [0], [0], [1], [0, 0, 1, 1], [], []>} : vector<8x16xf32>, vector<16x128xf32>, vector<8x128xf32> -> vector<8x128xf32>
    %131 = vector.broadcast %4 : vector<1x128xf32> to vector<8x128xf32>
    %132 = arith.addf %130, %131 : vector<8x128xf32>
    %cst_88 = arith.constant dense<0.000000e+00> : vector<8x128xf32>
    %133 = tpu.matmul %124, %5, %cst_88 {dimension_numbers = #tpu.dot_dimension_numbers<[1], [0], [0], [1], [0, 0, 1, 1], [], []>} : vector<8x128xf32>, vector<128x128xf32>, vector<8x128xf32> -> vector<8x128xf32>
    %134 = arith.addf %132, %133 : vector<8x128xf32>
    %135 = math.tanh %134 : vector<8x128xf32>
    %c11_89 = arith.constant 11 : index
    %c0_90 = arith.constant 0 : index
    %c0_91 = arith.constant 0 : index
    %136 = vector.load %arg6[%c11_89, %c0_90, %c0_91] : memref<16x8x128xf32, #tpu.memory_space<vmem>>, vector<1x8x128xf32>
    %137 = vector.shape_cast %136 : vector<1x8x128xf32> to vector<8x128xf32>
    %138 = vector.shape_cast %135 : vector<8x128xf32> to vector<1x8x128xf32>
    tpu.vector_store %arg6[%c11_89, %c0_90, %c0_91], %138 {strides = array<i32>} : memref<16x8x128xf32, #tpu.memory_space<vmem>>, vector<1x8x128xf32>,
    %c12 = arith.constant 12 : index
    %c0_92 = arith.constant 0 : index
    %c0_93 = arith.constant 0 : index
    %139 = vector.load %arg2[%c12, %c0_92, %c0_93] : memref<16x8x16xf32, #tpu.memory_space<vmem>>, vector<1x8x16xf32>
    %140 = vector.shape_cast %139 : vector<1x8x16xf32> to vector<8x16xf32>
    %cst_94 = arith.constant dense<0.000000e+00> : vector<8x128xf32>
    %141 = tpu.matmul %140, %3, %cst_94 {dimension_numbers = #tpu.dot_dimension_numbers<[1], [0], [0], [1], [0, 0, 1, 1], [], []>} : vector<8x16xf32>, vector<16x128xf32>, vector<8x128xf32> -> vector<8x128xf32>
    %142 = vector.broadcast %4 : vector<1x128xf32> to vector<8x128xf32>
    %143 = arith.addf %141, %142 : vector<8x128xf32>
    %cst_95 = arith.constant dense<0.000000e+00> : vector<8x128xf32>
    %144 = tpu.matmul %135, %5, %cst_95 {dimension_numbers = #tpu.dot_dimension_numbers<[1], [0], [0], [1], [0, 0, 1, 1], [], []>} : vector<8x128xf32>, vector<128x128xf32>, vector<8x128xf32> -> vector<8x128xf32>
    %145 = arith.addf %143, %144 : vector<8x128xf32>
    %146 = math.tanh %145 : vector<8x128xf32>
    %c12_96 = arith.constant 12 : index
    %c0_97 = arith.constant 0 : index
    %c0_98 = arith.constant 0 : index
    %147 = vector.load %arg6[%c12_96, %c0_97, %c0_98] : memref<16x8x128xf32, #tpu.memory_space<vmem>>, vector<1x8x128xf32>
    %148 = vector.shape_cast %147 : vector<1x8x128xf32> to vector<8x128xf32>
    %149 = vector.shape_cast %146 : vector<8x128xf32> to vector<1x8x128xf32>
    tpu.vector_store %arg6[%c12_96, %c0_97, %c0_98], %149 {strides = array<i32>} : memref<16x8x128xf32, #tpu.memory_space<vmem>>, vector<1x8x128xf32>,
    %c13 = arith.constant 13 : index
    %c0_99 = arith.constant 0 : index
    %c0_100 = arith.constant 0 : index
    %150 = vector.load %arg2[%c13, %c0_99, %c0_100] : memref<16x8x16xf32, #tpu.memory_space<vmem>>, vector<1x8x16xf32>
    %151 = vector.shape_cast %150 : vector<1x8x16xf32> to vector<8x16xf32>
    %cst_101 = arith.constant dense<0.000000e+00> : vector<8x128xf32>
    %152 = tpu.matmul %151, %3, %cst_101 {dimension_numbers = #tpu.dot_dimension_numbers<[1], [0], [0], [1], [0, 0, 1, 1], [], []>} : vector<8x16xf32>, vector<16x128xf32>, vector<8x128xf32> -> vector<8x128xf32>
    %153 = vector.broadcast %4 : vector<1x128xf32> to vector<8x128xf32>
    %154 = arith.addf %152, %153 : vector<8x128xf32>
    %cst_102 = arith.constant dense<0.000000e+00> : vector<8x128xf32>
    %155 = tpu.matmul %146, %5, %cst_102 {dimension_numbers = #tpu.dot_dimension_numbers<[1], [0], [0], [1], [0, 0, 1, 1], [], []>} : vector<8x128xf32>, vector<128x128xf32>, vector<8x128xf32> -> vector<8x128xf32>
    %156 = arith.addf %154, %155 : vector<8x128xf32>
    %157 = math.tanh %156 : vector<8x128xf32>
    %c13_103 = arith.constant 13 : index
    %c0_104 = arith.constant 0 : index
    %c0_105 = arith.constant 0 : index
    %158 = vector.load %arg6[%c13_103, %c0_104, %c0_105] : memref<16x8x128xf32, #tpu.memory_space<vmem>>, vector<1x8x128xf32>
    %159 = vector.shape_cast %158 : vector<1x8x128xf32> to vector<8x128xf32>
    %160 = vector.shape_cast %157 : vector<8x128xf32> to vector<1x8x128xf32>
    tpu.vector_store %arg6[%c13_103, %c0_104, %c0_105], %160 {strides = array<i32>} : memref<16x8x128xf32, #tpu.memory_space<vmem>>, vector<1x8x128xf32>,
    %c14 = arith.constant 14 : index
    %c0_106 = arith.constant 0 : index
    %c0_107 = arith.constant 0 : index
    %161 = vector.load %arg2[%c14, %c0_106, %c0_107] : memref<16x8x16xf32, #tpu.memory_space<vmem>>, vector<1x8x16xf32>
    %162 = vector.shape_cast %161 : vector<1x8x16xf32> to vector<8x16xf32>
    %cst_108 = arith.constant dense<0.000000e+00> : vector<8x128xf32>
    %163 = tpu.matmul %162, %3, %cst_108 {dimension_numbers = #tpu.dot_dimension_numbers<[1], [0], [0], [1], [0, 0, 1, 1], [], []>} : vector<8x16xf32>, vector<16x128xf32>, vector<8x128xf32> -> vector<8x128xf32>
    %164 = vector.broadcast %4 : vector<1x128xf32> to vector<8x128xf32>
    %165 = arith.addf %163, %164 : vector<8x128xf32>
    %cst_109 = arith.constant dense<0.000000e+00> : vector<8x128xf32>
    %166 = tpu.matmul %157, %5, %cst_109 {dimension_numbers = #tpu.dot_dimension_numbers<[1], [0], [0], [1], [0, 0, 1, 1], [], []>} : vector<8x128xf32>, vector<128x128xf32>, vector<8x128xf32> -> vector<8x128xf32>
    %167 = arith.addf %165, %166 : vector<8x128xf32>
    %168 = math.tanh %167 : vector<8x128xf32>
    %c14_110 = arith.constant 14 : index
    %c0_111 = arith.constant 0 : index
    %c0_112 = arith.constant 0 : index
    %169 = vector.load %arg6[%c14_110, %c0_111, %c0_112] : memref<16x8x128xf32, #tpu.memory_space<vmem>>, vector<1x8x128xf32>
    %170 = vector.shape_cast %169 : vector<1x8x128xf32> to vector<8x128xf32>
    %171 = vector.shape_cast %168 : vector<8x128xf32> to vector<1x8x128xf32>
    tpu.vector_store %arg6[%c14_110, %c0_111, %c0_112], %171 {strides = array<i32>} : memref<16x8x128xf32, #tpu.memory_space<vmem>>, vector<1x8x128xf32>,
    %c15 = arith.constant 15 : index
    %c0_113 = arith.constant 0 : index
    %c0_114 = arith.constant 0 : index
    %172 = vector.load %arg2[%c15, %c0_113, %c0_114] : memref<16x8x16xf32, #tpu.memory_space<vmem>>, vector<1x8x16xf32>
    %173 = vector.shape_cast %172 : vector<1x8x16xf32> to vector<8x16xf32>
    %cst_115 = arith.constant dense<0.000000e+00> : vector<8x128xf32>
    %174 = tpu.matmul %173, %3, %cst_115 {dimension_numbers = #tpu.dot_dimension_numbers<[1], [0], [0], [1], [0, 0, 1, 1], [], []>} : vector<8x16xf32>, vector<16x128xf32>, vector<8x128xf32> -> vector<8x128xf32>
    %175 = vector.broadcast %4 : vector<1x128xf32> to vector<8x128xf32>
    %176 = arith.addf %174, %175 : vector<8x128xf32>
    %cst_116 = arith.constant dense<0.000000e+00> : vector<8x128xf32>
    %177 = tpu.matmul %168, %5, %cst_116 {dimension_numbers = #tpu.dot_dimension_numbers<[1], [0], [0], [1], [0, 0, 1, 1], [], []>} : vector<8x128xf32>, vector<128x128xf32>, vector<8x128xf32> -> vector<8x128xf32>
    %178 = arith.addf %176, %177 : vector<8x128xf32>
    %179 = math.tanh %178 : vector<8x128xf32>
    %c15_117 = arith.constant 15 : index
    %c0_118 = arith.constant 0 : index
    %c0_119 = arith.constant 0 : index
    %180 = vector.load %arg6[%c15_117, %c0_118, %c0_119] : memref<16x8x128xf32, #tpu.memory_space<vmem>>, vector<1x8x128xf32>
    %181 = vector.shape_cast %180 : vector<1x8x128xf32> to vector<8x128xf32>
    %182 = vector.shape_cast %179 : vector<8x128xf32> to vector<1x8x128xf32>
    tpu.vector_store %arg6[%c15_117, %c0_118, %c0_119], %182 {strides = array<i32>} : memref<16x8x128xf32, #tpu.memory_space<vmem>>, vector<1x8x128xf32>,
    %c0_120 = arith.constant 0 : index
    %c0_121 = arith.constant 0 : index
    %183 = vector.load %arg7[%c0_120, %c0_121] : memref<8x128xf32, #tpu.memory_space<vmem>>, vector<8x128xf32>
    tpu.vector_store %arg7[%c0_120, %c0_121], %179 {strides = array<i32>} : memref<8x128xf32, #tpu.memory_space<vmem>>, vector<8x128xf32>,
    return
  }
  func.func @transform_0(%arg0: i32, %arg1: i32) -> (i32, i32, i32) {
    %c0_i32 = arith.constant 0 : i32
    %c0_i32_0 = arith.constant 0 : i32
    return %arg1, %arg0, %c0_i32 : i32, i32, i32
  }
  func.func @transform_1(%arg0: i32, %arg1: i32) -> (i32, i32) {
    %c0_i32 = arith.constant 0 : i32
    %c0_i32_0 = arith.constant 0 : i32
    %c0_i32_1 = arith.constant 0 : i32
    return %c0_i32, %c0_i32_0 : i32, i32
  }
  func.func @transform_2(%arg0: i32, %arg1: i32) -> (i32, i32) {
    %c0_i32 = arith.constant 0 : i32
    %c0_i32_0 = arith.constant 0 : i32
    %c0_i32_1 = arith.constant 0 : i32
    return %c0_i32, %c0_i32_0 : i32, i32
  }
  func.func @transform_3(%arg0: i32, %arg1: i32) -> (i32, i32) {
    %c0_i32 = arith.constant 0 : i32
    %c0_i32_0 = arith.constant 0 : i32
    %c0_i32_1 = arith.constant 0 : i32
    return %c0_i32, %c0_i32_0 : i32, i32
  }
  func.func @transform_4(%arg0: i32, %arg1: i32) -> (i32, i32, i32) {
    %c0_i32 = arith.constant 0 : i32
    %c0_i32_0 = arith.constant 0 : i32
    return %arg1, %arg0, %c0_i32 : i32, i32, i32
  }
}

</mosaic_0001>

<bundles_post_ra>
// kernel: tpu_custom_call.1
= control target key start
LH: loop header
LB: loop body
LE: loop exit
PB: predicated region body
PF: predicated region fallthrough
CT: control target
= control target key end

     0   :  { %9 = vsyncpa [#allocation4], 0  ;;  %s4680_s0 = inlined_call_operand.hbm [shape: f32[16,8,16], index: 0, kind: input, shape index: {}]   ;;  %s4681_s1 = inlined_call_operand.hbm [shape: f32[16,128], index: 1, kind: input, shape index: {}]   ;;  %s4682_s2 = inlined_call_operand.hbm [shape: f32[1,128], index: 2, kind: input, shape index: {}]   ;;  %s4683_s3 = inlined_call_operand.hbm [shape: f32[128,128], index: 3, kind: input, shape index: {}]   ;;  %s4684_s4 = inlined_call_operand.hbm [shape: f32[16,8,128], index: 4, kind: output, shape index: {}]  }
   0x1   :  { %10 = vsyncpa [#allocation7], 0 }
   0x2   :  { %11 = vsyncpa [#allocation10], 0 }
   0x3   :  { %12 = vsyncpa [#allocation5], 0  ;;  %s4154_s15 = smov [#allocation6]   ;;  %s4155_s17 = smov [#allocation3]  }
   0x4   :  { %s30_s16 = sshll.u32 %s4154_s15, 4  ;;  %s18_s18 = sshll.u32 %s4155_s17, 4  ;;  %s31_s16 = int_to_ptr.vmem [resolvable:$true] %s30_s16  ;;  %s4189_s18 = int_to_ptr.vmem [resolvable:$true] %s18_s18 }
   0x5   :  { %s4036_s21 = scalar_lea.hbm %s4681_s1, 256 }
   0x6   :  { %p4037_p0 = scmp.ne.s32.totalorder %s4681_s1, %s4036_s21  ;;  %p4040_p1 = scmp.lt.u32.totalorder %s4036_s21, %s4681_s1 }
   0x8   :  { %p4042_p2 = pnand %p4040_p1, %p4037_p0 }
   0xa   :  { %4045 = shalt.err (!%p4042_p2)
}
   0xb   :  { %s4046_s26 = scalar_lea.vmem %s31_s16, 256  ;;  %p4051_p4 = scmp.lt.s32.totalorder %s31_s16, %s31_s16 }
   0xc   :  { %p4047_p3 = scmp.ne.s32.totalorder %s31_s16, %s4046_s26  ;;  %p4052_p5 = scmp.lt.s32.totalorder %s4046_s26, %s4046_s26 }
   0xe   :  { %p4053_p6 = por %p4052_p5, %p4051_p4 }
  0x10   :  { %p4054_p7 = pnand %p4053_p6, %p4047_p3 }
  0x12   :  { %4057 = shalt.err (!%p4054_p7)
}
  0x13   :  { %s4156_s27 = smov 128   ;;  %s4157_s28 = smov 8  }
  0x14   :  { %36 = dma.hbm_to_vmem [thread:$0]  %s4681_s1, 256, %s31_s16, [#allocation7], %s4156_s27, %s4156_s27, %s4157_s28  }
  0x15   :  { %s4058_s7 = scalar_lea.hbm %s4680_s0, 2048 }
  0x16   :  { %p4059_p8 = scmp.ne.s32.totalorder %s4680_s0, %s4058_s7  ;;  %p4062_p9 = scmp.lt.u32.totalorder %s4058_s7, %s4680_s0 }
  0x18   :  { %p4064_p10 = pnand %p4062_p9, %p4059_p8 }
  0x1a   :  { %4067 = shalt.err (!%p4064_p10)
}
  0x1b   :  { %s4068_s12 = scalar_lea.vmem %s4189_s18, 2048  ;;  %p4073_p12 = scmp.lt.s32.totalorder %s4189_s18, %s4189_s18 }
  0x1c   :  { %p4069_p11 = scmp.ne.s32.totalorder %s4189_s18, %s4068_s12  ;;  %p4074_p13 = scmp.lt.s32.totalorder %s4068_s12, %s4068_s12 }
  0x1e   :  { %p4075_p0 = por %p4074_p13, %p4073_p12 }
  0x20   :  { %p4076_p1 = pnand %p4075_p0, %p4069_p11 }
  0x22   :  { %4079 = shalt.err (!%p4076_p1)
}
  0x23   :  { %24 = dma.hbm_to_vmem [thread:$0]  %s4680_s0, 2048, %s4189_s18, [#allocation4], %s4156_s27, %s4156_s27, %s4157_s28  }
  0x24   :  { %s4158_s14 = smov [#allocation8]   ;;  %s4159_s16 = smov [#allocation9]  }
  0x25   :  { %s43_s15 = sshll.u32 %s4158_s14, 4  ;;  %s52_s17 = sshll.u32 %s4159_s16, 4  ;;  %s44_s15 = int_to_ptr.vmem [resolvable:$true] %s43_s15  ;;  %s4226_s17 = int_to_ptr.vmem [resolvable:$true] %s52_s17 }
  0x26   :  { %s4080_s21 = scalar_lea.hbm %s4682_s2, 16 }
  0x27   :  { %p4081_p2 = scmp.ne.s32.totalorder %s4682_s2, %s4080_s21  ;;  %p4084_p3 = scmp.lt.u32.totalorder %s4080_s21, %s4682_s2 }
  0x29   :  { %p4086_p4 = pnand %p4084_p3, %p4081_p2 }
  0x2b   :  { %4089 = shalt.err (!%p4086_p4)
}
  0x2c   :  { %s4090_s0 = scalar_lea.vmem %s44_s15, 16  ;;  %s4094_s18 = scalar_lea.vmem %s44_s15, 32 }
  0x2d   :  { %p4091_p5 = scmp.ne.s32.totalorder %s44_s15, %s4090_s0  ;;  %p4095_p6 = scmp.lt.s32.totalorder %s44_s15, %s44_s15 }
  0x2e   :  { %p4096_p7 = scmp.lt.s32.totalorder %s4094_s18, %s4090_s0 }
  0x30   :  { %p4097_p8 = por %p4096_p7, %p4095_p6 }
  0x32   :  { %p4098_p9 = pnand %p4097_p8, %p4091_p5 }
  0x34   :  { %4101 = shalt.err (!%p4098_p9)
}
  0x35   :  { %46 = dma.hbm_to_vmem [thread:$0]  %s4682_s2, 16, %s44_s15, [#allocation7]  }
  0x36   :  { %s4102_s6 = scalar_lea.hbm %s4683_s3, 2048 }
  0x37   :  { %p4103_p10 = scmp.ne.s32.totalorder %s4683_s3, %s4102_s6  ;;  %p4106_p11 = scmp.lt.u32.totalorder %s4102_s6, %s4683_s3 }
  0x39   :  { %p4108_p12 = pnand %p4106_p11, %p4103_p10 }
  0x3b   :  { %4111 = shalt.err (!%p4108_p12)
}
  0x3c   :  { %s4112_s11 = scalar_lea.vmem %s4226_s17, 2048  ;;  %p4117_p0 = scmp.lt.s32.totalorder %s4226_s17, %s4226_s17 }
  0x3d   :  { %p4113_p13 = scmp.ne.s32.totalorder %s4226_s17, %s4112_s11  ;;  %p4118_p1 = scmp.lt.s32.totalorder %s4112_s11, %s4112_s11 }
  0x3f   :  { %p4119_p2 = por %p4118_p1, %p4117_p0 }
  0x41   :  { %p4120_p3 = pnand %p4119_p2, %p4113_p13 }
  0x43   :  { %4123 = shalt.err (!%p4120_p3)
}
  0x44   :  { %58 = dma.hbm_to_vmem [thread:$0]  %s4683_s3, 2048, %s4226_s17, [#allocation10], %s4156_s27, %s4156_s27, %s4157_s28  }
  0x45   :  { %4146 = dma.done.wait [#allocation4], 2048  }
  0x46   :  { %4147 = vsyncadd [#allocation4], 4294965248 }
  0x47   :  { %4148 = dma.done.wait [#allocation7], 272  }
  0x48   :  { %4149 = vsyncadd [#allocation7], 4294967024 }
  0x49   :  { %4150 = dma.done.wait [#allocation10], 2048  }
  0x4a   :  { %4151 = vsyncadd [#allocation10], 4294965248  ;;  %v4160_v0 = vmov 0.0|0.0   ;;  %vm4161_vm0 = vmmov 0   ;;  %v4162_v1 = vmov 0.0   ;;  %v76_v2 = vld [vmem:[#allocation6] sm:$0xff] }
  0x4b   :  { %3514 = vmatprep.subr.bf16.mxu0 %v4160_v0  ;;  %2846 = vmatprep.mubr.msk.f32.mxu0 %vm4161_vm0, %v4162_v1  ;;  %v77_v3 = vld [vmem:[#allocation6 + $0x8] sm:$0xff]  ;;  %v79_v5 = vld [vmem:[#allocation9] sm:$0xff]  ;;  %v80_v6 = vld [vmem:[#allocation9 + $0x8] sm:$0xff]  ;;  %vm103_vm1 = vcmask 130048   ;;  %s4163_s3 = smov [#allocation11]  }
  0x4c   :  { %3541 = vmatprep.subr.bf16.mxu1 %v4160_v0  ;;  %2888 = vmatprep.mubr.msk.f32.mxu1 %vm4161_vm0, %v4162_v1  ;;  %v4266_v4 = vpack.c.bf16 %v77_v3, %v76_v2  ;;  %v96_v7 = vld [vmem:[#allocation3] sm:$0xff]  ;;  %v4269_v8 = vpack.c.bf16 %v80_v6, %v79_v5  ;;  %v82_v10 = vld [vmem:[#allocation9 + $0x18] sm:$0xff]  ;;  %v83_v13 = vld [vmem:[#allocation9 + $0x20] sm:$0xff]  ;;  %s2491_s1 = sshll.u32 %s4163_s3, 4  ;;  %s2492_s1 = int_to_ptr.vmem [resolvable:$true] %s2491_s1 }
  0x4d   :  { %v81_v9 = vld [vmem:[#allocation9 + $0x10] sm:$0xff]  ;;  %v84_v14 = vld [vmem:[#allocation9 + $0x28] sm:$0xff]  ;;  %v86_v17 = vld [vmem:[#allocation9 + $0x38] sm:$0xff]  ;;  %s4124_s13 = scalar_lea.vmem %s2492_s1, 2048  ;;  %p4129_p5 = scmp.lt.s32.totalorder %s2492_s1, %s2492_s1 }
  0x4e   :  { %3516 = vmatpush3.bf16.msra.mxu0 %v4266_v4  ;;  %3543 = vmatpush3.bf16.msra.mxu1 %v4266_v4  ;;  %v251_v11 = vld [vmem:[#allocation3 + $0x8] sm:$0xff]  ;;  %v4276_v12 = vpack.c.bf16 %v82_v10, %v81_v9  ;;  %v4287_v15 = vpack.c.bf16 %v84_v14, %v83_v13  ;;  %v87_v19 = vld [vmem:[#allocation9 + $0x40] sm:$0xff]  ;;  %v88_v20 = vld [vmem:[#allocation9 + $0x48] sm:$0xff]  ;;  %p4125_p4 = scmp.ne.s32.totalorder %s2492_s1, %s4124_s13  ;;  %p4130_p6 = scmp.lt.s32.totalorder %s4124_s13, %s4124_s13 }
  0x4f   :  { %3517 = vmatprep.subr.bf16.mxu0 %v4160_v0  ;;  %3544 = vmatprep.subr.bf16.mxu1 %v4160_v0  ;;  %v85_v16 = vld [vmem:[#allocation9 + $0x30] sm:$0xff]  ;;  %v4299_v21 = vpack.c.bf16 %v88_v20, %v87_v19  ;;  %v90_v23 = vld [vmem:[#allocation9 + $0x58] sm:$0xff]  ;;  %v91_v25 = vld [vmem:[#allocation9 + $0x60] sm:$0xff] }
  0x50   :  { %v4293_v18 = vpack.c.bf16 %v86_v17, %v85_v16  ;;  %v89_v22 = vld [vmem:[#allocation9 + $0x50] sm:$0xff]  ;;  %v92_v26 = vld [vmem:[#allocation9 + $0x68] sm:$0xff]  ;;  %v94_v29 = vld [vmem:[#allocation9 + $0x78] sm:$0xff]  ;;  %p4131_p7 = por %p4130_p6, %p4129_p5 }
  0x51   :  { %2847 = vmatmul.mubr.msk.f32.vlgmr.msra.gmra.mrb[0].mxu0 %vm103_vm1, %v96_v7  ;;  %2889 = vmatmul.mubr.msk.f32.vlgmr.msra.gmra.mrb[0].mxu1 %vm103_vm1, %v251_v11  ;;  %v4305_v24 = vpack.c.bf16 %v90_v23, %v89_v22  ;;  %v4311_v27 = vpack.c.bf16 %v92_v26, %v91_v25  ;;  %v93_v28 = vld [vmem:[#allocation9 + $0x70] sm:$0xff]  ;;  %v400_v31 = vld [vmem:[#allocation3 + $0x10] sm:$0xff]  ;;  %v549_v37 = vld [vmem:[#allocation3 + $0x18] sm:$0xff] }
  0x52   :  { %3519 = vmatpush3.bf16.msra.mxu0 %v4269_v8  ;;  %2881 = vmatprep.mubr.msk.f32.mxu0 %vm4161_vm0, %v4162_v1  ;;  %v4317_v30 = vpack.c.bf16 %v94_v29, %v93_v28  ;;  %v4350_v32 = vld [vmem:[#allocation8] ss:$0 sm:$0xff]  ;;  %v698_v42 = vld [vmem:[#allocation3 + $0x20] sm:$0xff]  ;;  %v847_v47 = vld [vmem:[#allocation3 + $0x28] sm:$0xff]  ;;  %p4132_p8 = pnand %p4131_p7, %p4125_p4 }
  0x53   :  { %3520 = vmatprep.subr.bf16.mxu0 %v4160_v0  ;;  %3546 = vmatpush3.bf16.msra.mxu1 %v4269_v8  ;;  %v996_v52 = vld [vmem:[#allocation3 + $0x30] sm:$0xff]  ;;  %v1145_v57 = vld [vmem:[#allocation3 + $0x38] sm:$0xff]  ;;  %v1294_v62 = vld [vmem:[#allocation3 + $0x40] sm:$0xff] }
  0x54   :  { %2923 = vmatprep.mubr.msk.f32.mxu1 %vm4161_vm0, %v4162_v1  ;;  %3547 = vmatprep.subr.bf16.mxu1 %v4160_v0  ;;  %v1443_v6 = vld [vmem:[#allocation3 + $0x48] sm:$0xff]  ;;  %v1592_v13 = vld [vmem:[#allocation3 + $0x50] sm:$0xff]  ;;  %v1741_v20 = vld [vmem:[#allocation3 + $0x58] sm:$0xff] }
  0x55   :  { %v1890_v28 = vld [vmem:[#allocation3 + $0x60] sm:$0xff] }
  0x56   :  { %3522 = vmatpush3.bf16.msra.mxu0 %v4276_v12 }
  0x57   :  { %3523 = vmatprep.subr.bf16.mxu0 %v4160_v0  ;;  %3549 = vmatpush3.bf16.msra.mxu1 %v4276_v12 }
  0x58   :  { %3550 = vmatprep.subr.bf16.mxu1 %v4160_v0 }
  0x5a   :  { %3525 = vmatpush3.bf16.msra.mxu0 %v4287_v15 }
  0x5b   :  { %3526 = vmatprep.subr.bf16.mxu0 %v4160_v0  ;;  %3552 = vmatpush3.bf16.msra.mxu1 %v4287_v15 }
  0x5c   :  { %3553 = vmatprep.subr.bf16.mxu1 %v4160_v0 }
  0x5e   :  { %3528 = vmatpush3.bf16.msra.mxu0 %v4293_v18 }
  0x5f   :  { %3529 = vmatprep.subr.bf16.mxu0 %v4160_v0  ;;  %3555 = vmatpush3.bf16.msra.mxu1 %v4293_v18 }
  0x60   :  { %3556 = vmatprep.subr.bf16.mxu1 %v4160_v0 }
  0x62   :  { %3531 = vmatpush3.bf16.msra.mxu0 %v4299_v21 }
  0x63   :  { %3532 = vmatprep.subr.bf16.mxu0 %v4160_v0  ;;  %3558 = vmatpush3.bf16.msra.mxu1 %v4299_v21 }
  0x64   :  { %3559 = vmatprep.subr.bf16.mxu1 %v4160_v0 }
  0x66   :  { %3534 = vmatpush3.bf16.msra.mxu0 %v4305_v24 }
  0x67   :  { %3535 = vmatprep.subr.bf16.mxu0 %v4160_v0  ;;  %3561 = vmatpush3.bf16.msra.mxu1 %v4305_v24 }
  0x68   :  { %3562 = vmatprep.subr.bf16.mxu1 %v4160_v0 }
  0x6a   :  { %3537 = vmatpush3.bf16.msra.mxu0 %v4311_v27 }
  0x6b   :  { %3538 = vmatprep.subr.bf16.mxu0 %v4160_v0  ;;  %3564 = vmatpush3.bf16.msra.mxu1 %v4311_v27 }
  0x6c   :  { %3565 = vmatprep.subr.bf16.mxu1 %v4160_v0 }
  0x6e   :  { %3540 = vmatpush3.bf16.msra.mxu0 %v4317_v30 }
  0x6f   :  { %3568 = vmatprep.subr.bf16.mxu0 %v4160_v0  ;;  %3567 = vmatpush3.bf16.msra.mxu1 %v4317_v30 }
  0x70   :  { %3595 = vmatprep.subr.bf16.mxu1 %v4160_v0 }
  0x71   :  { %2882 = vmatmul.mubr.f32.vlgmr.msra.gmra.mrb[0].mxu0 %v4162_v1 }
  0x72   :  { %3570 = vmatpush3.bf16.msra.mxu0 %v4266_v4  ;;  %2930 = vmatprep.mubr.msk.f32.mxu0 %vm4161_vm0, %v4162_v1 }
  0x73   :  { %3571 = vmatprep.subr.bf16.mxu0 %v4160_v0 }
  0x75   :  { %2931 = vmatmul.mubr.msk.f32.vlgmr.msra.gmra.mrb[2].mxu0 %vm103_vm1, %v400_v31 }
  0x76   :  { %3573 = vmatpush3.bf16.msra.mxu0 %v4269_v8  ;;  %2965 = vmatprep.mubr.msk.f32.mxu0 %vm4161_vm0, %v4162_v1 }
  0x77   :  { %3574 = vmatprep.subr.bf16.mxu0 %v4160_v0 }
  0x7a   :  { %3576 = vmatpush3.bf16.msra.mxu0 %v4276_v12 }
  0x7b   :  { %3577 = vmatprep.subr.bf16.mxu0 %v4160_v0 }
  0x7e   :  { %3579 = vmatpush3.bf16.msra.mxu0 %v4287_v15 }
  0x7f   :  { %3580 = vmatprep.subr.bf16.mxu0 %v4160_v0 }
  0x82   :  { %3582 = vmatpush3.bf16.msra.mxu0 %v4293_v18 }
  0x83   :  { %3583 = vmatprep.subr.bf16.mxu0 %v4160_v0 }
  0x86   :  { %3585 = vmatpush3.bf16.msra.mxu0 %v4299_v21 }
  0x87   :  { %3586 = vmatprep.subr.bf16.mxu0 %v4160_v0 }
  0x8a   :  { %3588 = vmatpush3.bf16.msra.mxu0 %v4305_v24 }
  0x8b   :  { %3589 = vmatprep.subr.bf16.mxu0 %v4160_v0 }
  0x8e   :  { %3591 = vmatpush3.bf16.msra.mxu0 %v4311_v27 }
  0x8f   :  { %3592 = vmatprep.subr.bf16.mxu0 %v4160_v0 }
  0x92   :  { %3594 = vmatpush3.bf16.msra.mxu0 %v4317_v30 }
  0x93   :  { %3622 = vmatprep.subr.bf16.mxu0 %v4160_v0 }
 0x144   :  { %v243_v33 = vpop.f32.mrb[0].mxu0 }
 0x145   :  { %v3946_v34 = vadd.f32 %v4350_v32, %v243_v33  ;;  %v2883_v35 = vpop.f32.mrb[1].mxu0 }
 0x146   :  { %v2039_v35 = vld [vmem:[#allocation3 + $0x68] sm:$0xff] }
 0x147   :  { %4004 = vtanh.f32 %v3946_v34 }
 0x151   :  { %v4005_v36 = vpop.eup %4004 }
 0x152   :  { %249 = vst [vmem:[#allocation11] sm:$0xff] %v4005_v36  ;;  %2924 = vmatmul.mubr.f32.vlgmr.msra.gmra.mrb[0].mxu1 %v4005_v36 }
 0x153   :  { %3597 = vmatpush3.bf16.msra.mxu1 %v4266_v4  ;;  %2972 = vmatprep.mubr.msk.f32.mxu1 %vm4161_vm0, %v4162_v1 }
 0x154   :  { %3598 = vmatprep.subr.bf16.mxu1 %v4160_v0 }
 0x156   :  { %2973 = vmatmul.mubr.msk.f32.vlgmr.msra.gmra.mrb[2].mxu1 %vm103_vm1, %v549_v37 }
 0x157   :  { %3600 = vmatpush3.bf16.msra.mxu1 %v4269_v8  ;;  %3007 = vmatprep.mubr.msk.f32.mxu1 %vm4161_vm0, %v4162_v1 }
 0x158   :  { %3601 = vmatprep.subr.bf16.mxu1 %v4160_v0 }
 0x15b   :  { %3603 = vmatpush3.bf16.msra.mxu1 %v4276_v12 }
 0x15c   :  { %3604 = vmatprep.subr.bf16.mxu1 %v4160_v0 }
 0x15f   :  { %3606 = vmatpush3.bf16.msra.mxu1 %v4287_v15 }
 0x160   :  { %3607 = vmatprep.subr.bf16.mxu1 %v4160_v0 }
 0x163   :  { %3609 = vmatpush3.bf16.msra.mxu1 %v4293_v18 }
 0x164   :  { %3610 = vmatprep.subr.bf16.mxu1 %v4160_v0 }
 0x167   :  { %3612 = vmatpush3.bf16.msra.mxu1 %v4299_v21 }
 0x168   :  { %3613 = vmatprep.subr.bf16.mxu1 %v4160_v0 }
 0x16b   :  { %3615 = vmatpush3.bf16.msra.mxu1 %v4305_v24 }
 0x16c   :  { %3616 = vmatprep.subr.bf16.mxu1 %v4160_v0 }
 0x16f   :  { %3618 = vmatpush3.bf16.msra.mxu1 %v4311_v27 }
 0x170   :  { %3619 = vmatprep.subr.bf16.mxu1 %v4160_v0 }
 0x173   :  { %3621 = vmatpush3.bf16.msra.mxu1 %v4317_v30 }
 0x174   :  { %3649 = vmatprep.subr.bf16.mxu1 %v4160_v0 }
 0x225   :  { %v391_v38 = vpop.f32.mrb[0].mxu1 }
 0x226   :  { %v3947_v39 = vadd.f32 %v4350_v32, %v391_v38  ;;  %v2925_v40 = vpop.f32.mrb[1].mxu1 }
 0x227   :  { %v2188_v40 = vld [vmem:[#allocation3 + $0x70] sm:$0xff] }
 0x228   :  { %4006 = vtanh.f32 %v3947_v39 }
 0x232   :  { %v4007_v41 = vpop.eup %4006 }
 0x233   :  { %398 = vst [vmem:[#allocation11 + $0x8] sm:$0xff] %v4007_v41  ;;  %2966 = vmatmul.mubr.f32.vlgmr.msra.gmra.mrb[2].mxu0 %v4007_v41 }
 0x234   :  { %3624 = vmatpush3.bf16.msra.mxu0 %v4266_v4  ;;  %3014 = vmatprep.mubr.msk.f32.mxu0 %vm4161_vm0, %v4162_v1 }
 0x235   :  { %3625 = vmatprep.subr.bf16.mxu0 %v4160_v0 }
 0x237   :  { %3015 = vmatmul.mubr.msk.f32.vlgmr.msra.gmra.mrb[4].mxu0 %vm103_vm1, %v698_v42 }
 0x238   :  { %3627 = vmatpush3.bf16.msra.mxu0 %v4269_v8  ;;  %3049 = vmatprep.mubr.msk.f32.mxu0 %vm4161_vm0, %v4162_v1 }
 0x239   :  { %3628 = vmatprep.subr.bf16.mxu0 %v4160_v0 }
 0x23c   :  { %3630 = vmatpush3.bf16.msra.mxu0 %v4276_v12 }
 0x23d   :  { %3631 = vmatprep.subr.bf16.mxu0 %v4160_v0 }
 0x240   :  { %3633 = vmatpush3.bf16.msra.mxu0 %v4287_v15 }
 0x241   :  { %3634 = vmatprep.subr.bf16.mxu0 %v4160_v0 }
 0x244   :  { %3636 = vmatpush3.bf16.msra.mxu0 %v4293_v18 }
 0x245   :  { %3637 = vmatprep.subr.bf16.mxu0 %v4160_v0 }
 0x248   :  { %3639 = vmatpush3.bf16.msra.mxu0 %v4299_v21 }
 0x249   :  { %3640 = vmatprep.subr.bf16.mxu0 %v4160_v0 }
 0x24c   :  { %3642 = vmatpush3.bf16.msra.mxu0 %v4305_v24 }
 0x24d   :  { %3643 = vmatprep.subr.bf16.mxu0 %v4160_v0 }
 0x250   :  { %3645 = vmatpush3.bf16.msra.mxu0 %v4311_v27 }
 0x251   :  { %3646 = vmatprep.subr.bf16.mxu0 %v4160_v0 }
 0x254   :  { %3648 = vmatpush3.bf16.msra.mxu0 %v4317_v30 }
 0x255   :  { %3676 = vmatprep.subr.bf16.mxu0 %v4160_v0 }
 0x306   :  { %v540_v43 = vpop.f32.mrb[2].mxu0 }
 0x307   :  { %v3948_v44 = vadd.f32 %v4350_v32, %v540_v43  ;;  %v2967_v45 = vpop.f32.mrb[3].mxu0 }
 0x308   :  { %v2337_v45 = vld [vmem:[#allocation3 + $0x78] sm:$0xff] }
 0x309   :  { %4008 = vtanh.f32 %v3948_v44 }
 0x313   :  { %v4009_v46 = vpop.eup %4008 }
 0x314   :  { %547 = vst [vmem:[#allocation11 + $0x10] sm:$0xff] %v4009_v46  ;;  %3008 = vmatmul.mubr.f32.vlgmr.msra.gmra.mrb[2].mxu1 %v4009_v46 }
 0x315   :  { %3651 = vmatpush3.bf16.msra.mxu1 %v4266_v4  ;;  %3056 = vmatprep.mubr.msk.f32.mxu1 %vm4161_vm0, %v4162_v1 }
 0x316   :  { %3652 = vmatprep.subr.bf16.mxu1 %v4160_v0 }
 0x318   :  { %3057 = vmatmul.mubr.msk.f32.vlgmr.msra.gmra.mrb[4].mxu1 %vm103_vm1, %v847_v47 }
 0x319   :  { %3654 = vmatpush3.bf16.msra.mxu1 %v4269_v8  ;;  %3091 = vmatprep.mubr.msk.f32.mxu1 %vm4161_vm0, %v4162_v1 }
 0x31a   :  { %3655 = vmatprep.subr.bf16.mxu1 %v4160_v0 }
 0x31d   :  { %3657 = vmatpush3.bf16.msra.mxu1 %v4276_v12 }
 0x31e   :  { %3658 = vmatprep.subr.bf16.mxu1 %v4160_v0 }
 0x321   :  { %3660 = vmatpush3.bf16.msra.mxu1 %v4287_v15 }
 0x322   :  { %3661 = vmatprep.subr.bf16.mxu1 %v4160_v0 }
 0x325   :  { %3663 = vmatpush3.bf16.msra.mxu1 %v4293_v18 }
 0x326   :  { %3664 = vmatprep.subr.bf16.mxu1 %v4160_v0 }
 0x329   :  { %3666 = vmatpush3.bf16.msra.mxu1 %v4299_v21 }
 0x32a   :  { %3667 = vmatprep.subr.bf16.mxu1 %v4160_v0 }
 0x32d   :  { %3669 = vmatpush3.bf16.msra.mxu1 %v4305_v24 }
 0x32e   :  { %3670 = vmatprep.subr.bf16.mxu1 %v4160_v0 }
 0x331   :  { %3672 = vmatpush3.bf16.msra.mxu1 %v4311_v27 }
 0x332   :  { %3673 = vmatprep.subr.bf16.mxu1 %v4160_v0 }
 0x335   :  { %3675 = vmatpush3.bf16.msra.mxu1 %v4317_v30 }
 0x336   :  { %3703 = vmatprep.subr.bf16.mxu1 %v4160_v0 }
 0x3e7   :  { %v689_v48 = vpop.f32.mrb[2].mxu1 }
 0x3e8   :  { %v3949_v49 = vadd.f32 %v4350_v32, %v689_v48  ;;  %v3009_v50 = vpop.f32.mrb[3].mxu1 }
 0x3ea   :  { %4010 = vtanh.f32 %v3949_v49 }
 0x3f4   :  { %v4011_v51 = vpop.eup %4010 }
 0x3f5   :  { %696 = vst [vmem:[#allocation11 + $0x18] sm:$0xff] %v4011_v51  ;;  %3050 = vmatmul.mubr.f32.vlgmr.msra.gmra.mrb[4].mxu0 %v4011_v51 }
 0x3f6   :  { %3678 = vmatpush3.bf16.msra.mxu0 %v4266_v4  ;;  %3098 = vmatprep.mubr.msk.f32.mxu0 %vm4161_vm0, %v4162_v1 }
 0x3f7   :  { %3679 = vmatprep.subr.bf16.mxu0 %v4160_v0 }
 0x3f9   :  { %3099 = vmatmul.mubr.msk.f32.vlgmr.msra.gmra.mrb[6].mxu0 %vm103_vm1, %v996_v52 }
 0x3fa   :  { %3681 = vmatpush3.bf16.msra.mxu0 %v4269_v8  ;;  %3133 = vmatprep.mubr.msk.f32.mxu0 %vm4161_vm0, %v4162_v1 }
 0x3fb   :  { %3682 = vmatprep.subr.bf16.mxu0 %v4160_v0 }
 0x3fe   :  { %3684 = vmatpush3.bf16.msra.mxu0 %v4276_v12 }
 0x3ff   :  { %3685 = vmatprep.subr.bf16.mxu0 %v4160_v0 }
 0x402   :  { %3687 = vmatpush3.bf16.msra.mxu0 %v4287_v15 }
 0x403   :  { %3688 = vmatprep.subr.bf16.mxu0 %v4160_v0 }
 0x406   :  { %3690 = vmatpush3.bf16.msra.mxu0 %v4293_v18 }
 0x407   :  { %3691 = vmatprep.subr.bf16.mxu0 %v4160_v0 }
 0x40a   :  { %3693 = vmatpush3.bf16.msra.mxu0 %v4299_v21 }
 0x40b   :  { %3694 = vmatprep.subr.bf16.mxu0 %v4160_v0 }
 0x40e   :  { %3696 = vmatpush3.bf16.msra.mxu0 %v4305_v24 }
 0x40f   :  { %3697 = vmatprep.subr.bf16.mxu0 %v4160_v0 }
 0x412   :  { %3699 = vmatpush3.bf16.msra.mxu0 %v4311_v27 }
 0x413   :  { %3700 = vmatprep.subr.bf16.mxu0 %v4160_v0 }
 0x416   :  { %3702 = vmatpush3.bf16.msra.mxu0 %v4317_v30 }
 0x417   :  { %3730 = vmatprep.subr.bf16.mxu0 %v4160_v0 }
 0x4c8   :  { %v838_v53 = vpop.f32.mrb[4].mxu0 }
 0x4c9   :  { %v3950_v54 = vadd.f32 %v4350_v32, %v838_v53  ;;  %v3051_v55 = vpop.f32.mrb[5].mxu0 }
 0x4cb   :  { %4012 = vtanh.f32 %v3950_v54 }
 0x4d5   :  { %v4013_v56 = vpop.eup %4012 }
 0x4d6   :  { %845 = vst [vmem:[#allocation11 + $0x20] sm:$0xff] %v4013_v56  ;;  %3092 = vmatmul.mubr.f32.vlgmr.msra.gmra.mrb[4].mxu1 %v4013_v56 }
 0x4d7   :  { %3705 = vmatpush3.bf16.msra.mxu1 %v4266_v4  ;;  %3140 = vmatprep.mubr.msk.f32.mxu1 %vm4161_vm0, %v4162_v1 }
 0x4d8   :  { %3706 = vmatprep.subr.bf16.mxu1 %v4160_v0 }
 0x4da   :  { %3141 = vmatmul.mubr.msk.f32.vlgmr.msra.gmra.mrb[6].mxu1 %vm103_vm1, %v1145_v57 }
 0x4db   :  { %3708 = vmatpush3.bf16.msra.mxu1 %v4269_v8  ;;  %3175 = vmatprep.mubr.msk.f32.mxu1 %vm4161_vm0, %v4162_v1 }
 0x4dc   :  { %3709 = vmatprep.subr.bf16.mxu1 %v4160_v0 }
 0x4df   :  { %3711 = vmatpush3.bf16.msra.mxu1 %v4276_v12 }
 0x4e0   :  { %3712 = vmatprep.subr.bf16.mxu1 %v4160_v0 }
 0x4e3   :  { %3714 = vmatpush3.bf16.msra.mxu1 %v4287_v15 }
 0x4e4   :  { %3715 = vmatprep.subr.bf16.mxu1 %v4160_v0 }
 0x4e7   :  { %3717 = vmatpush3.bf16.msra.mxu1 %v4293_v18 }
 0x4e8   :  { %3718 = vmatprep.subr.bf16.mxu1 %v4160_v0 }
 0x4eb   :  { %3720 = vmatpush3.bf16.msra.mxu1 %v4299_v21 }
 0x4ec   :  { %3721 = vmatprep.subr.bf16.mxu1 %v4160_v0 }
 0x4ef   :  { %3723 = vmatpush3.bf16.msra.mxu1 %v4305_v24 }
 0x4f0   :  { %3724 = vmatprep.subr.bf16.mxu1 %v4160_v0 }
 0x4f3   :  { %3726 = vmatpush3.bf16.msra.mxu1 %v4311_v27 }
 0x4f4   :  { %3727 = vmatprep.subr.bf16.mxu1 %v4160_v0 }
 0x4f7   :  { %3729 = vmatpush3.bf16.msra.mxu1 %v4317_v30 }
 0x4f8   :  { %3757 = vmatprep.subr.bf16.mxu1 %v4160_v0 }
 0x5a9   :  { %v987_v58 = vpop.f32.mrb[4].mxu1 }
 0x5aa   :  { %v3951_v59 = vadd.f32 %v4350_v32, %v987_v58  ;;  %v3093_v60 = vpop.f32.mrb[5].mxu1 }
 0x5ac   :  { %4014 = vtanh.f32 %v3951_v59 }
 0x5b6   :  { %v4015_v61 = vpop.eup %4014 }
 0x5b7   :  { %994 = vst [vmem:[#allocation11 + $0x28] sm:$0xff] %v4015_v61  ;;  %3134 = vmatmul.mubr.f32.vlgmr.msra.gmra.mrb[6].mxu0 %v4015_v61 }
 0x5b8   :  { %3732 = vmatpush3.bf16.msra.mxu0 %v4266_v4  ;;  %3182 = vmatprep.mubr.msk.f32.mxu0 %vm4161_vm0, %v4162_v1 }
 0x5b9   :  { %3733 = vmatprep.subr.bf16.mxu0 %v4160_v0 }
 0x5bb   :  { %3183 = vmatmul.mubr.msk.f32.vlgmr.msra.gmra.mrb[8].mxu0 %vm103_vm1, %v1294_v62 }
 0x5bc   :  { %3735 = vmatpush3.bf16.msra.mxu0 %v4269_v8  ;;  %3217 = vmatprep.mubr.msk.f32.mxu0 %vm4161_vm0, %v4162_v1 }
 0x5bd   :  { %3736 = vmatprep.subr.bf16.mxu0 %v4160_v0 }
 0x5c0   :  { %3738 = vmatpush3.bf16.msra.mxu0 %v4276_v12 }
 0x5c1   :  { %3739 = vmatprep.subr.bf16.mxu0 %v4160_v0 }
 0x5c4   :  { %3741 = vmatpush3.bf16.msra.mxu0 %v4287_v15 }
 0x5c5   :  { %3742 = vmatprep.subr.bf16.mxu0 %v4160_v0 }
 0x5c8   :  { %3744 = vmatpush3.bf16.msra.mxu0 %v4293_v18 }
 0x5c9   :  { %3745 = vmatprep.subr.bf16.mxu0 %v4160_v0 }
 0x5cc   :  { %3747 = vmatpush3.bf16.msra.mxu0 %v4299_v21 }
 0x5cd   :  { %3748 = vmatprep.subr.bf16.mxu0 %v4160_v0 }
 0x5d0   :  { %3750 = vmatpush3.bf16.msra.mxu0 %v4305_v24 }
 0x5d1   :  { %3751 = vmatprep.subr.bf16.mxu0 %v4160_v0 }
 0x5d4   :  { %3753 = vmatpush3.bf16.msra.mxu0 %v4311_v27 }
 0x5d5   :  { %3754 = vmatprep.subr.bf16.mxu0 %v4160_v0 }
 0x5d8   :  { %3756 = vmatpush3.bf16.msra.mxu0 %v4317_v30 }
 0x5d9   :  { %3784 = vmatprep.subr.bf16.mxu0 %v4160_v0 }
 0x68a   :  { %v1136_v63 = vpop.f32.mrb[6].mxu0 }
 0x68b   :  { %v3952_v2 = vadd.f32 %v4350_v32, %v1136_v63  ;;  %v3135_v3 = vpop.f32.mrb[7].mxu0 }
 0x68d   :  { %4016 = vtanh.f32 %v3952_v2 }
 0x697   :  { %v4017_v5 = vpop.eup %4016 }
 0x698   :  { %1143 = vst [vmem:[#allocation11 + $0x30] sm:$0xff] %v4017_v5  ;;  %3176 = vmatmul.mubr.f32.vlgmr.msra.gmra.mrb[6].mxu1 %v4017_v5 }
 0x699   :  { %3759 = vmatpush3.bf16.msra.mxu1 %v4266_v4  ;;  %3224 = vmatprep.mubr.msk.f32.mxu1 %vm4161_vm0, %v4162_v1 }
 0x69a   :  { %3760 = vmatprep.subr.bf16.mxu1 %v4160_v0 }
 0x69c   :  { %3225 = vmatmul.mubr.msk.f32.vlgmr.msra.gmra.mrb[8].mxu1 %vm103_vm1, %v1443_v6 }
 0x69d   :  { %3762 = vmatpush3.bf16.msra.mxu1 %v4269_v8  ;;  %3259 = vmatprep.mubr.msk.f32.mxu1 %vm4161_vm0, %v4162_v1 }
 0x69e   :  { %3763 = vmatprep.subr.bf16.mxu1 %v4160_v0 }
 0x6a1   :  { %3765 = vmatpush3.bf16.msra.mxu1 %v4276_v12 }
 0x6a2   :  { %3766 = vmatprep.subr.bf16.mxu1 %v4160_v0 }
 0x6a5   :  { %3768 = vmatpush3.bf16.msra.mxu1 %v4287_v15 }
 0x6a6   :  { %3769 = vmatprep.subr.bf16.mxu1 %v4160_v0 }
 0x6a9   :  { %3771 = vmatpush3.bf16.msra.mxu1 %v4293_v18 }
 0x6aa   :  { %3772 = vmatprep.subr.bf16.mxu1 %v4160_v0 }
 0x6ad   :  { %3774 = vmatpush3.bf16.msra.mxu1 %v4299_v21 }
 0x6ae   :  { %3775 = vmatprep.subr.bf16.mxu1 %v4160_v0 }
 0x6b1   :  { %3777 = vmatpush3.bf16.msra.mxu1 %v4305_v24 }
 0x6b2   :  { %3778 = vmatprep.subr.bf16.mxu1 %v4160_v0 }
 0x6b5   :  { %3780 = vmatpush3.bf16.msra.mxu1 %v4311_v27 }
 0x6b6   :  { %3781 = vmatprep.subr.bf16.mxu1 %v4160_v0 }
 0x6b9   :  { %3783 = vmatpush3.bf16.msra.mxu1 %v4317_v30 }
 0x6ba   :  { %3811 = vmatprep.subr.bf16.mxu1 %v4160_v0 }
 0x76b   :  { %v1285_v7 = vpop.f32.mrb[6].mxu1 }
 0x76c   :  { %v3953_v9 = vadd.f32 %v4350_v32, %v1285_v7  ;;  %v3177_v10 = vpop.f32.mrb[7].mxu1 }
 0x76e   :  { %4018 = vtanh.f32 %v3953_v9 }
 0x778   :  { %v4019_v11 = vpop.eup %4018 }
 0x779   :  { %1292 = vst [vmem:[#allocation11 + $0x38] sm:$0xff] %v4019_v11  ;;  %3218 = vmatmul.mubr.f32.vlgmr.msra.gmra.mrb[8].mxu0 %v4019_v11 }
 0x77a   :  { %3786 = vmatpush3.bf16.msra.mxu0 %v4266_v4  ;;  %3266 = vmatprep.mubr.msk.f32.mxu0 %vm4161_vm0, %v4162_v1 }
 0x77b   :  { %3787 = vmatprep.subr.bf16.mxu0 %v4160_v0 }
 0x77d   :  { %3267 = vmatmul.mubr.msk.f32.vlgmr.msra.gmra.mrb[10].mxu0 %vm103_vm1, %v1592_v13 }
 0x77e   :  { %3789 = vmatpush3.bf16.msra.mxu0 %v4269_v8  ;;  %3301 = vmatprep.mubr.msk.f32.mxu0 %vm4161_vm0, %v4162_v1 }
 0x77f   :  { %3790 = vmatprep.subr.bf16.mxu0 %v4160_v0 }
 0x782   :  { %3792 = vmatpush3.bf16.msra.mxu0 %v4276_v12 }
 0x783   :  { %3793 = vmatprep.subr.bf16.mxu0 %v4160_v0 }
 0x786   :  { %3795 = vmatpush3.bf16.msra.mxu0 %v4287_v15 }
 0x787   :  { %3796 = vmatprep.subr.bf16.mxu0 %v4160_v0 }
 0x78a   :  { %3798 = vmatpush3.bf16.msra.mxu0 %v4293_v18 }
 0x78b   :  { %3799 = vmatprep.subr.bf16.mxu0 %v4160_v0 }
 0x78e   :  { %3801 = vmatpush3.bf16.msra.mxu0 %v4299_v21 }
 0x78f   :  { %3802 = vmatprep.subr.bf16.mxu0 %v4160_v0 }
 0x792   :  { %3804 = vmatpush3.bf16.msra.mxu0 %v4305_v24 }
 0x793   :  { %3805 = vmatprep.subr.bf16.mxu0 %v4160_v0 }
 0x796   :  { %3807 = vmatpush3.bf16.msra.mxu0 %v4311_v27 }
 0x797   :  { %3808 = vmatprep.subr.bf16.mxu0 %v4160_v0 }
 0x79a   :  { %3810 = vmatpush3.bf16.msra.mxu0 %v4317_v30 }
 0x79b   :  { %3838 = vmatprep.subr.bf16.mxu0 %v4160_v0 }
 0x84c   :  { %v1434_v14 = vpop.f32.mrb[8].mxu0 }
 0x84d   :  { %v3954_v16 = vadd.f32 %v4350_v32, %v1434_v14  ;;  %v3219_v17 = vpop.f32.mrb[9].mxu0 }
 0x84f   :  { %4020 = vtanh.f32 %v3954_v16 }
 0x859   :  { %v4021_v19 = vpop.eup %4020 }
 0x85a   :  { %1441 = vst [vmem:[#allocation11 + $0x40] sm:$0xff] %v4021_v19  ;;  %3260 = vmatmul.mubr.f32.vlgmr.msra.gmra.mrb[8].mxu1 %v4021_v19 }
 0x85b   :  { %3813 = vmatpush3.bf16.msra.mxu1 %v4266_v4  ;;  %3308 = vmatprep.mubr.msk.f32.mxu1 %vm4161_vm0, %v4162_v1 }
 0x85c   :  { %3814 = vmatprep.subr.bf16.mxu1 %v4160_v0 }
 0x85e   :  { %3309 = vmatmul.mubr.msk.f32.vlgmr.msra.gmra.mrb[10].mxu1 %vm103_vm1, %v1741_v20 }
 0x85f   :  { %3816 = vmatpush3.bf16.msra.mxu1 %v4269_v8  ;;  %3343 = vmatprep.mubr.msk.f32.mxu1 %vm4161_vm0, %v4162_v1 }
 0x860   :  { %3817 = vmatprep.subr.bf16.mxu1 %v4160_v0 }
 0x863   :  { %3819 = vmatpush3.bf16.msra.mxu1 %v4276_v12 }
 0x864   :  { %3820 = vmatprep.subr.bf16.mxu1 %v4160_v0 }
 0x867   :  { %3822 = vmatpush3.bf16.msra.mxu1 %v4287_v15 }
 0x868   :  { %3823 = vmatprep.subr.bf16.mxu1 %v4160_v0 }
 0x86b   :  { %3825 = vmatpush3.bf16.msra.mxu1 %v4293_v18 }
 0x86c   :  { %3826 = vmatprep.subr.bf16.mxu1 %v4160_v0 }
 0x86f   :  { %3828 = vmatpush3.bf16.msra.mxu1 %v4299_v21 }
 0x870   :  { %3829 = vmatprep.subr.bf16.mxu1 %v4160_v0 }
 0x873   :  { %3831 = vmatpush3.bf16.msra.mxu1 %v4305_v24 }
 0x874   :  { %3832 = vmatprep.subr.bf16.mxu1 %v4160_v0 }
 0x877   :  { %3834 = vmatpush3.bf16.msra.mxu1 %v4311_v27 }
 0x878   :  { %3835 = vmatprep.subr.bf16.mxu1 %v4160_v0 }
 0x87b   :  { %3837 = vmatpush3.bf16.msra.mxu1 %v4317_v30 }
 0x87c   :  { %3865 = vmatprep.subr.bf16.mxu1 %v4160_v0 }
 0x92d   :  { %v1583_v22 = vpop.f32.mrb[8].mxu1 }
 0x92e   :  { %v3955_v23 = vadd.f32 %v4350_v32, %v1583_v22  ;;  %v3261_v25 = vpop.f32.mrb[9].mxu1 }
 0x930   :  { %4022 = vtanh.f32 %v3955_v23 }
 0x93a   :  { %v4023_v26 = vpop.eup %4022 }
 0x93b   :  { %1590 = vst [vmem:[#allocation11 + $0x48] sm:$0xff] %v4023_v26  ;;  %3302 = vmatmul.mubr.f32.vlgmr.msra.gmra.mrb[10].mxu0 %v4023_v26 }
 0x93c   :  { %3840 = vmatpush3.bf16.msra.mxu0 %v4266_v4  ;;  %3350 = vmatprep.mubr.msk.f32.mxu0 %vm4161_vm0, %v4162_v1 }
 0x93d   :  { %3841 = vmatprep.subr.bf16.mxu0 %v4160_v0 }
 0x93f   :  { %3351 = vmatmul.mubr.msk.f32.vlgmr.msra.gmra.mrb[12].mxu0 %vm103_vm1, %v1890_v28 }
 0x940   :  { %3843 = vmatpush3.bf16.msra.mxu0 %v4269_v8  ;;  %3385 = vmatprep.mubr.msk.f32.mxu0 %vm4161_vm0, %v4162_v1 }
 0x941   :  { %3844 = vmatprep.subr.bf16.mxu0 %v4160_v0 }
 0x944   :  { %3846 = vmatpush3.bf16.msra.mxu0 %v4276_v12 }
 0x945   :  { %3847 = vmatprep.subr.bf16.mxu0 %v4160_v0 }
 0x948   :  { %3849 = vmatpush3.bf16.msra.mxu0 %v4287_v15 }
 0x949   :  { %3850 = vmatprep.subr.bf16.mxu0 %v4160_v0 }
 0x94c   :  { %3852 = vmatpush3.bf16.msra.mxu0 %v4293_v18 }
 0x94d   :  { %3853 = vmatprep.subr.bf16.mxu0 %v4160_v0 }
 0x950   :  { %3855 = vmatpush3.bf16.msra.mxu0 %v4299_v21 }
 0x951   :  { %3856 = vmatprep.subr.bf16.mxu0 %v4160_v0 }
 0x954   :  { %3858 = vmatpush3.bf16.msra.mxu0 %v4305_v24 }
 0x955   :  { %3859 = vmatprep.subr.bf16.mxu0 %v4160_v0 }
 0x958   :  { %3861 = vmatpush3.bf16.msra.mxu0 %v4311_v27 }
 0x959   :  { %3862 = vmatprep.subr.bf16.mxu0 %v4160_v0 }
 0x95c   :  { %3864 = vmatpush3.bf16.msra.mxu0 %v4317_v30 }
 0x95d   :  { %3892 = vmatprep.subr.bf16.mxu0 %v4160_v0 }
 0xa0e   :  { %v1732_v29 = vpop.f32.mrb[10].mxu0 }
 0xa0f   :  { %v3956_v31 = vadd.f32 %v4350_v32, %v1732_v29  ;;  %v3303_v33 = vpop.f32.mrb[11].mxu0 }
 0xa11   :  { %4024 = vtanh.f32 %v3956_v31 }
 0xa1b   :  { %v4025_v34 = vpop.eup %4024 }
 0xa1c   :  { %1739 = vst [vmem:[#allocation11 + $0x50] sm:$0xff] %v4025_v34  ;;  %3344 = vmatmul.mubr.f32.vlgmr.msra.gmra.mrb[10].mxu1 %v4025_v34 }
 0xa1d   :  { %3867 = vmatpush3.bf16.msra.mxu1 %v4266_v4  ;;  %3392 = vmatprep.mubr.msk.f32.mxu1 %vm4161_vm0, %v4162_v1 }
 0xa1e   :  { %3868 = vmatprep.subr.bf16.mxu1 %v4160_v0 }
 0xa20   :  { %3393 = vmatmul.mubr.msk.f32.vlgmr.msra.gmra.mrb[12].mxu1 %vm103_vm1, %v2039_v35 }
 0xa21   :  { %3870 = vmatpush3.bf16.msra.mxu1 %v4269_v8  ;;  %3427 = vmatprep.mubr.msk.f32.mxu1 %vm4161_vm0, %v4162_v1 }
 0xa22   :  { %3871 = vmatprep.subr.bf16.mxu1 %v4160_v0 }
 0xa25   :  { %3873 = vmatpush3.bf16.msra.mxu1 %v4276_v12 }
 0xa26   :  { %3874 = vmatprep.subr.bf16.mxu1 %v4160_v0 }
 0xa29   :  { %3876 = vmatpush3.bf16.msra.mxu1 %v4287_v15 }
 0xa2a   :  { %3877 = vmatprep.subr.bf16.mxu1 %v4160_v0 }
 0xa2d   :  { %3879 = vmatpush3.bf16.msra.mxu1 %v4293_v18 }
 0xa2e   :  { %3880 = vmatprep.subr.bf16.mxu1 %v4160_v0 }
 0xa31   :  { %3882 = vmatpush3.bf16.msra.mxu1 %v4299_v21 }
 0xa32   :  { %3883 = vmatprep.subr.bf16.mxu1 %v4160_v0 }
 0xa35   :  { %3885 = vmatpush3.bf16.msra.mxu1 %v4305_v24 }
 0xa36   :  { %3886 = vmatprep.subr.bf16.mxu1 %v4160_v0 }
 0xa39   :  { %3888 = vmatpush3.bf16.msra.mxu1 %v4311_v27 }
 0xa3a   :  { %3889 = vmatprep.subr.bf16.mxu1 %v4160_v0 }
 0xa3d   :  { %3891 = vmatpush3.bf16.msra.mxu1 %v4317_v30 }
 0xa3e   :  { %3919 = vmatprep.subr.bf16.mxu1 %v4160_v0 }
 0xaef   :  { %v1881_v36 = vpop.f32.mrb[10].mxu1 }
 0xaf0   :  { %v3957_v37 = vadd.f32 %v4350_v32, %v1881_v36  ;;  %v3345_v38 = vpop.f32.mrb[11].mxu1 }
 0xaf2   :  { %4026 = vtanh.f32 %v3957_v37 }
 0xafc   :  { %v4027_v39 = vpop.eup %4026 }
 0xafd   :  { %1888 = vst [vmem:[#allocation11 + $0x58] sm:$0xff] %v4027_v39  ;;  %3386 = vmatmul.mubr.f32.vlgmr.msra.gmra.mrb[12].mxu0 %v4027_v39 }
 0xafe   :  { %3894 = vmatpush3.bf16.msra.mxu0 %v4266_v4  ;;  %3434 = vmatprep.mubr.msk.f32.mxu0 %vm4161_vm0, %v4162_v1 }
 0xaff   :  { %3895 = vmatprep.subr.bf16.mxu0 %v4160_v0 }
 0xb01   :  { %3435 = vmatmul.mubr.msk.f32.vlgmr.msra.gmra.mrb[14].mxu0 %vm103_vm1, %v2188_v40 }
 0xb02   :  { %3897 = vmatpush3.bf16.msra.mxu0 %v4269_v8  ;;  %3469 = vmatprep.mubr.msk.f32.mxu0 %vm4161_vm0, %v4162_v1 }
 0xb03   :  { %3898 = vmatprep.subr.bf16.mxu0 %v4160_v0 }
 0xb06   :  { %3900 = vmatpush3.bf16.msra.mxu0 %v4276_v12 }
 0xb07   :  { %3901 = vmatprep.subr.bf16.mxu0 %v4160_v0 }
 0xb0a   :  { %3903 = vmatpush3.bf16.msra.mxu0 %v4287_v15 }
 0xb0b   :  { %3904 = vmatprep.subr.bf16.mxu0 %v4160_v0 }
 0xb0e   :  { %3906 = vmatpush3.bf16.msra.mxu0 %v4293_v18 }
 0xb0f   :  { %3907 = vmatprep.subr.bf16.mxu0 %v4160_v0 }
 0xb12   :  { %3909 = vmatpush3.bf16.msra.mxu0 %v4299_v21 }
 0xb13   :  { %3910 = vmatprep.subr.bf16.mxu0 %v4160_v0 }
 0xb16   :  { %3912 = vmatpush3.bf16.msra.mxu0 %v4305_v24 }
 0xb17   :  { %3913 = vmatprep.subr.bf16.mxu0 %v4160_v0 }
 0xb1a   :  { %3915 = vmatpush3.bf16.msra.mxu0 %v4311_v27 }
 0xb1b   :  { %3916 = vmatprep.subr.bf16.mxu0 %v4160_v0 }
 0xb1e   :  { %3918 = vmatpush3.bf16.msra.mxu0 %v4317_v30 }
 0xbd0   :  { %v2030_v41 = vpop.f32.mrb[12].mxu0 }
 0xbd1   :  { %v3958_v42 = vadd.f32 %v4350_v32, %v2030_v41  ;;  %v3387_v43 = vpop.f32.mrb[13].mxu0 }
 0xbd3   :  { %4028 = vtanh.f32 %v3958_v42 }
 0xbdd   :  { %v4029_v44 = vpop.eup %4028 }
 0xbde   :  { %2037 = vst [vmem:[#allocation11 + $0x60] sm:$0xff] %v4029_v44  ;;  %3428 = vmatmul.mubr.f32.vlgmr.msra.gmra.mrb[12].mxu1 %v4029_v44 }
 0xbdf   :  { %3921 = vmatpush3.bf16.msra.mxu1 %v4266_v4  ;;  %3476 = vmatprep.mubr.msk.f32.mxu1 %vm4161_vm0, %v4162_v1 }
 0xbe0   :  { %3922 = vmatprep.subr.bf16.mxu1 %v4160_v0 }
 0xbe2   :  { %3477 = vmatmul.mubr.msk.f32.vlgmr.msra.gmra.mrb[14].mxu1 %vm103_vm1, %v2337_v45 }
 0xbe3   :  { %3924 = vmatpush3.bf16.msra.mxu1 %v4269_v8  ;;  %3511 = vmatprep.mubr.msk.f32.mxu1 %vm4161_vm0, %v4162_v1 }
 0xbe4   :  { %3925 = vmatprep.subr.bf16.mxu1 %v4160_v0 }
 0xbe7   :  { %3927 = vmatpush3.bf16.msra.mxu1 %v4276_v12 }
 0xbe8   :  { %3928 = vmatprep.subr.bf16.mxu1 %v4160_v0 }
 0xbeb   :  { %3930 = vmatpush3.bf16.msra.mxu1 %v4287_v15 }
 0xbec   :  { %3931 = vmatprep.subr.bf16.mxu1 %v4160_v0 }
 0xbef   :  { %3933 = vmatpush3.bf16.msra.mxu1 %v4293_v18 }
 0xbf0   :  { %3934 = vmatprep.subr.bf16.mxu1 %v4160_v0 }
 0xbf3   :  { %3936 = vmatpush3.bf16.msra.mxu1 %v4299_v21 }
 0xbf4   :  { %3937 = vmatprep.subr.bf16.mxu1 %v4160_v0 }
 0xbf7   :  { %3939 = vmatpush3.bf16.msra.mxu1 %v4305_v24 }
 0xbf8   :  { %3940 = vmatprep.subr.bf16.mxu1 %v4160_v0 }
 0xbfb   :  { %3942 = vmatpush3.bf16.msra.mxu1 %v4311_v27 }
 0xbfc   :  { %3943 = vmatprep.subr.bf16.mxu1 %v4160_v0 }
 0xbff   :  { %3945 = vmatpush3.bf16.msra.mxu1 %v4317_v30 }
 0xcb1   :  { %v2179_v1 = vpop.f32.mrb[12].mxu1 }
 0xcb2   :  { %v3959_v4 = vadd.f32 %v4350_v32, %v2179_v1  ;;  %v3429_v8 = vpop.f32.mrb[13].mxu1 }
 0xcb4   :  { %4030 = vtanh.f32 %v3959_v4 }
 0xcbe   :  { %v4031_v12 = vpop.eup %4030 }
 0xcbf   :  { %2186 = vst [vmem:[#allocation11 + $0x68] sm:$0xff] %v4031_v12  ;;  %3470 = vmatmul.mubr.f32.vlgmr.msra.gmra.mrb[14].mxu0 %v4031_v12 }
 0xd92   :  { %v2328_v15 = vpop.f32.mrb[14].mxu0 }
 0xd93   :  { %v3960_v18 = vadd.f32 %v4350_v32, %v2328_v15  ;;  %v3471_v21 = vpop.f32.mrb[15].mxu0 }
 0xd95   :  { %4032 = vtanh.f32 %v3960_v18 }
 0xd9f   :  { %v4033_v24 = vpop.eup %4032 }
 0xda0   :  { %2335 = vst [vmem:[#allocation11 + $0x70] sm:$0xff] %v4033_v24  ;;  %3512 = vmatmul.mubr.f32.vlgmr.msra.gmra.mrb[14].mxu1 %v4033_v24 }
 0xe73   :  { %v2477_v27 = vpop.f32.mrb[14].mxu1 }
 0xe74   :  { %v3961_v0 = vadd.f32 %v4350_v32, %v2477_v27  ;;  %v3513_v30 = vpop.f32.mrb[15].mxu1 }
 0xe76   :  { %4034 = vtanh.f32 %v3961_v0 }
 0xe80   :  { %v4035_v46 = vpop.eup %4034 }
 0xe81   :  { %2484 = vst [vmem:[#allocation11 + $0x78] sm:$0xff] %v4035_v46 }
 0xe82   :  { %4135 = shalt.err (!%p4132_p8)
}
 0xe83   :  { %s4136_s16 = scalar_lea.hbm %s4684_s4, 2048 }
 0xe84   :  { %p4137_p9 = scmp.ne.s32.totalorder %s4684_s4, %s4136_s16  ;;  %p4140_p10 = scmp.lt.u32.totalorder %s4136_s16, %s4684_s4 }
 0xe86   :  { %p4142_p11 = pnand %p4140_p10, %p4137_p9 }
 0xe88   :  { %4145 = shalt.err (!%p4142_p11)
}
 0xe89   :  { %2497 = dma.vmem_to_hbm [thread:$0]  %s2492_s1, 2048, %s4684_s4, [#allocation5], %s4156_s27, %s4156_s27, %s4157_s28  }
 0xe8a   :  { %4152 = dma.done.wait [#allocation5], 2048  }
 0xe8b   :  { %4153 = vsyncadd [#allocation5], 4294965248 }
 0xe8c   :  { %2501 = vsyncpa [#allocation4], 1 }
 0xe8d   :  { %2502 = vsyncpa [#allocation7], 1 }
 0xe8e   :  { %2503 = vsyncpa [#allocation10], 1 }
 0xe8f   :  { %2504 = vsyncpa [#allocation5], 1 }

</bundles_post_ra>
